<compile_context>
chip_gen: v7x
topology: tpu7x:2x2x1
jax: 0.10.0
libtpu: 0.0.40
codegen_flags: <defaults>
</compile_context>

<pallas_src>
import math

import numpy as np
import jax
import jax.numpy as jnp
from jax.experimental import pallas as pl
from jax.experimental.pallas import tpu as pltpu

# ----------------------------- model config (small) ------------------------
IMAGE_SIZE = 16
PATCH = 8
WIDTH = 32            # d_model
LAYERS = 2
HEADS = 2             # head_dim = 16
MLP_RATIO = 4.0
OUTPUT_DIM = 16
BATCH = 2
INIT_UNC_BIAS = -10.0

GRID_HW = IMAGE_SIZE // PATCH
NUM_PATCH = GRID_HW * GRID_HW
SEQ = NUM_PATCH + 2          # [cls] + [unc] + patches   (embed_unc=True)
MLP_W = int(WIDTH * MLP_RATIO)
HEAD_DIM = WIDTH // HEADS
PATCH_FEAT = 3 * PATCH * PATCH
LN_EPS = 1e-5

# folded-batch token slab:
#   rows [cls_img0, cls_img1, unc_img0, unc_img1, patches_img0 (4), patches_img1 (4)]
TOK = BATCH * SEQ            # 12 token rows total
CLS_ROWS = 2 * BATCH         # 4 cls/unc rows at the top
NPATCH_ROWS = BATCH * NUM_PATCH

# `vecs` slab layout: one vector per row, zero-padded to 128 lanes (f32)
VEC_LANES = 128
R_LNPRE_W, R_LNPRE_B, R_LNPOST_W, R_LNPOST_B, R_UNCB = 0, 1, 2, 3, 4
VEC_L0 = 5
VEC_PER_LAYER = 8            # ln1_w, ln1_b, bqkv, bo, ln2_w, ln2_b, bfc, bpr
VEC_ROWS = VEC_L0 + LAYERS * VEC_PER_LAYER

assert 3 * WIDTH <= VEC_LANES and MLP_W <= VEC_LANES


# ----------------------------- in-kernel helpers ---------------------------
def _layernorm(x, w, b):
    mu = jnp.mean(x, axis=-1, keepdims=True)
    var = jnp.mean((x - mu) ** 2, axis=-1, keepdims=True)
    return (x - mu) * jax.lax.rsqrt(var + LN_EPS) * w + b


def _gelu_tanh(x):
    # tanh-approx GELU (EUP tanh); within test tolerance of exact-erf nn.GELU
    return 0.5 * x * (1.0 + jnp.tanh(0.7978845608028654 * (x + 0.044715 * x * x * x)))


# ----------------------------- fused kernel ---------------------------------
def fused_vit_kernel(patches_ref, base_ref, mask_ref, vecs_ref,
                     wpatch_ref, wlyr_ref, wpr_ref, whead_ref, out_ref):
    f32, bf16 = jnp.float32, jnp.bfloat16
    D = WIDTH

    vecs = vecs_ref[...]                                   # (VEC_ROWS, 128) f32

    def vrow(r, n):
        return vecs[r:r + 1, 0:n]                          # (1, n) static slice

    lnpre_w, lnpre_b = vrow(R_LNPRE_W, D), vrow(R_LNPRE_B, D)
    lnpost_w, lnpost_b = vrow(R_LNPOST_W, D), vrow(R_LNPOST_B, D)
    uncb = vrow(R_UNCB, OUTPUT_DIM)
    mask = mask_ref[...]                                   # (TOK, TOK) 0 / -1e9

    # --- patch embedding: only real patch rows hit the MXU; cls/unc rows come
    #     from the host-precomputed base slab (which also carries pos-embed).
    tok = jnp.dot(patches_ref[...].astype(bf16), wpatch_ref[...],
                  preferred_element_type=f32)              # (B*NP, D)
    base = base_ref[...]                                   # (TOK, D)
    x = jnp.concatenate([base[0:CLS_ROWS, :], base[CLS_ROWS:, :] + tok], axis=0)
    x = _layernorm(x, lnpre_w, lnpre_b)                    # (TOK, D) f32

    scale = 1.0 / math.sqrt(HEAD_DIM)
    for l in range(LAYERS):
        r = VEC_L0 + l * VEC_PER_LAYER
        ln1w, ln1b = vrow(r + 0, D), vrow(r + 1, D)
        bqkv, bo = vrow(r + 2, 3 * D), vrow(r + 3, D)
        ln2w, ln2b = vrow(r + 4, D), vrow(r + 5, D)
        bfc, bpr = vrow(r + 6, MLP_W), vrow(r + 7, D)

        wl = wlyr_ref[l]                                   # (D, 3D+D+MLP_W) bf16
        wqkv = wl[:, 0:3 * D]
        wo = wl[:, 3 * D:4 * D]
        wfc = wl[:, 4 * D:4 * D + MLP_W]
        wpr = wpr_ref[l]                                   # (MLP_W, D) bf16

        # ---- attention: fused QKV matmul, per-head masked softmax, fused out-proj
        h = _layernorm(x, ln1w, ln1b).astype(bf16)
        qkv = jnp.dot(h, wqkv, preferred_element_type=f32) + bqkv     # (TOK, 3D)
        heads = []
        for i in range(HEADS):
            o = i * HEAD_DIM
            qh = qkv[:, o:o + HEAD_DIM].astype(bf16)
            kh = qkv[:, D + o:D + o + HEAD_DIM].astype(bf16)
            vh = qkv[:, 2 * D + o:2 * D + o + HEAD_DIM].astype(bf16)
            s = jax.lax.dot_general(qh, kh, (((1,), (1,)), ((), ())),
                                    preferred_element_type=f32) * scale + mask
            s = s - jnp.max(s, axis=-1, keepdims=True)
            p = jnp.exp(s)
            p = p / jnp.sum(p, axis=-1, keepdims=True)                 # exact softmax
            heads.append(jnp.dot(p.astype(bf16), vh, preferred_element_type=f32))
        attn = jnp.concatenate(heads, axis=-1).astype(bf16)            # (TOK, D)
        x = x + jnp.dot(attn, wo, preferred_element_type=f32) + bo     # ls_1 = Identity

        # ---- MLP ----
        h = _layernorm(x, ln2w, ln2b).astype(bf16)
        h = jnp.dot(h, wfc, preferred_element_type=f32) + bfc
        h = _gelu_tanh(h).astype(bf16)
        x = x + jnp.dot(h, wpr, preferred_element_type=f32) + bpr      # ls_2 = Identity

    # ---- head: ln_post on cls/unc rows; ln_post applied again to the cls token
    #      (matches the PyTorch reference: ln_post(x) then ln_post(x[:,0])).
    t = _layernorm(x[0:CLS_ROWS, :], lnpost_w, lnpost_b)               # (2B, D)
    pooled = _layernorm(t[0:BATCH, :], lnpost_w, lnpost_b)             # (B, D)
    pooled_std = t[BATCH:CLS_ROWS, :]                                  # (B, D)
    mean = jnp.dot(pooled.astype(bf16), whead_ref[:, 0:OUTPUT_DIM],
                   preferred_element_type=f32)                         # (B, O)
    std = jnp.dot(pooled_std.astype(bf16),
                  whead_ref[:, OUTPUT_DIM:2 * OUTPUT_DIM],
                  preferred_element_type=f32) + uncb                   # (B, O)
    out_ref[...] = jnp.concatenate([mean, std], axis=-1)               # single store


# ----------------------------- host-side packing / wrapper ------------------
KP_ORDER = ["base", "mask", "vecs", "wpatch", "wlyr", "wpr", "whead"]


def pack_params(p):
    """One-time host-side re-layout of natural (PyTorch-like) params."""
    bf16 = jnp.bfloat16

    def pad_row(v):
        v = jnp.asarray(v, jnp.float32).reshape(-1)
        return jnp.pad(v, (0, VEC_LANES - v.shape[0]))

    rows = [pad_row(p["ln_pre_w"]), pad_row(p["ln_pre_b"]),
            pad_row(p["ln_post_w"]), pad_row(p["ln_post_b"]),
            pad_row(p["unc_b"])]
    for b in p["blocks"]:
        rows += [pad_row(b["ln1_w"]), pad_row(b["ln1_b"]),
                 pad_row(b["bqkv"]), pad_row(b["bo"]),
                 pad_row(b["ln2_w"]), pad_row(b["ln2_b"]),
                 pad_row(b["bfc"]), pad_row(b["bpr"])]
    vecs = jnp.stack(rows, axis=0)                               # (VEC_ROWS, 128) f32

    # per-layer matrices, lane-concatenated: [wqkv (3D) | wo (D) | wfc (MLP_W)]
    wlyr = jnp.stack(
        [jnp.concatenate([b["wqkv"], b["wo"], b["wfc"]], axis=1) for b in p["blocks"]],
        axis=0).astype(bf16)                                     # (L, D, 4D+MLP_W)
    wpr = jnp.stack([b["wpr"] for b in p["blocks"]], axis=0).astype(bf16)  # (L, MLP_W, D)

    # folded-batch base slab (cls/unc tokens + positional embedding)
    pos = p["positional_embedding"]                              # (SEQ, D)
    cls_row = p["class_embedding"][None, :] + pos[0:1]
    unc_row = p["unc_embedding"][None, :] + pos[1:2]
    base = jnp.concatenate([jnp.tile(cls_row, (BATCH, 1)),
                            jnp.tile(unc_row, (BATCH, 1)),
                            jnp.tile(pos[2:], (BATCH, 1))], axis=0)  # (TOK, D) f32

    # block-diagonal attention bias: 0 within an image, -1e9 across images
    img_id = np.concatenate([np.tile(np.arange(BATCH), 2),
                             np.repeat(np.arange(BATCH), NUM_PATCH)])
    mask = jnp.asarray(np.where(img_id[:, None] == img_id[None, :], 0.0, -1e9),
                       jnp.float32)                              # (TOK, TOK)

    return dict(
        base=base, mask=mask, vecs=vecs,
        wpatch=p["conv1_w"].reshape(WIDTH, PATCH_FEAT).T.astype(bf16),    # (3PP, D)
        wlyr=wlyr, wpr=wpr,
        whead=jnp.concatenate([p["proj"], p["unc_w"]], axis=1).astype(bf16),  # (D, 2O)
    )


def vit_forward(kp, x_nchw):
    # TODO(synk): image_mask_ratio (torch.randperm token masking) not implemented;
    # only the default forward path (image_mask_ratio=None) is reproduced.
    bsz = x_nchw.shape[0]
    assert bsz == BATCH, "kernel is specialized to the folded batch size"
    # patchify (pure layout): conv1 with stride==kernel becomes a matmul in-kernel
    xp = x_nchw.reshape(bsz, 3, GRID_HW, PATCH, GRID_HW, PATCH)
    patches = xp.transpose(0, 2, 4, 1, 3, 5).reshape(bsz * NUM_PATCH, PATCH_FEAT)

    operands = [patches] + [kp[k] for k in KP_ORDER]

    def full_spec(a):
        nd = a.ndim
        return pl.BlockSpec(a.shape, lambda i, _n=nd: (0,) * _n)

    out = pl.pallas_call(
        fused_vit_kernel,
        # batch folded into the sublane axis -> a single grid step; weights are
        # fetched once (single step, so no redundant double-buffer traffic).
        grid=(1,),
        out_shape=jax.ShapeDtypeStruct((BATCH, 2 * OUTPUT_DIM), jnp.float32),
        in_specs=[full_spec(a) for a in operands],
        out_specs=pl.BlockSpec((BATCH, 2 * OUTPUT_DIM), lambda i: (0, 0)),
        compiler_params=pltpu.CompilerParams(dimension_semantics=("arbitrary",)),
    )(*operands)
    return {"mean": out[:, :OUTPUT_DIM], "std": out[:, OUTPUT_DIM:]}


# ----------------------------- pure-JAX reference ---------------------------
def _ln_ref(x, w, b):
    mu = jnp.mean(x, axis=-1, keepdims=True)
    var = jnp.mean((x - mu) ** 2, axis=-1, keepdims=True)
    return (x - mu) * jax.lax.rsqrt(var + LN_EPS) * w + b


def reference_forward(p, x_nchw):
    bsz = x_nchw.shape[0]
    xp = x_nchw.reshape(bsz, 3, GRID_HW, PATCH, GRID_HW, PATCH)
    xp = xp.transpose(0, 2, 4, 1, 3, 5).reshape(bsz, NUM_PATCH, PATCH_FEAT)
    tokens = xp @ p["conv1_w"].reshape(WIDTH, -1).T
    cls = jnp.broadcast_to(p["class_embedding"][None, None, :], (bsz, 1, WIDTH))
    unc = jnp.broadcast_to(p["unc_embedding"][None, None, :], (bsz, 1, WIDTH))
    x = jnp.concatenate([cls, unc, tokens], axis=1) + p["positional_embedding"][None]
    x = _ln_ref(x, p["ln_pre_w"][0], p["ln_pre_b"][0])
    hd = WIDTH // HEADS
    for b in p["blocks"]:
        h = _ln_ref(x, b["ln1_w"][0], b["ln1_b"][0])
        qkv = h @ b["wqkv"] + b["bqkv"][0]
        q, k, v = jnp.split(qkv, 3, axis=-1)
        q = q.reshape(bsz, SEQ, HEADS, hd)
        k = k.reshape(bsz, SEQ, HEADS, hd)
        v = v.reshape(bsz, SEQ, HEADS, hd)
        s = jnp.einsum("bqhd,bkhd->bhqk", q, k) / math.sqrt(hd)
        a = jax.nn.softmax(s, axis=-1)
        o = jnp.einsum("bhqk,bkhd->bqhd", a, v).reshape(bsz, SEQ, WIDTH)
        x = x + (o @ b["wo"] + b["bo"][0])
        h = _ln_ref(x, b["ln2_w"][0], b["ln2_b"][0])
        h = jax.nn.gelu(h @ b["wfc"] + b["bfc"][0], approximate=False)
        x = x + (h @ b["wpr"] + b["bpr"][0])
    x = _ln_ref(x, p["ln_post_w"][0], p["ln_post_b"][0])
    pooled = _ln_ref(x[:, 0], p["ln_post_w"][0], p["ln_post_b"][0])
    pooled_std = x[:, 1]
    return pooled @ p["proj"], pooled_std @ p["unc_w"] + p["unc_b"][0]


# ----------------------------- deterministic params -------------------------
def init_params(key):
    scale = WIDTH ** -0.5
    ks = iter(jax.random.split(key, 64))
    nrm = lambda shp, std: jax.random.normal(next(ks), shp, jnp.float32) * std
    p = {
        "conv1_w": nrm((WIDTH, 3, PATCH, PATCH), 0.02),
        "class_embedding": nrm((WIDTH,), scale),
        "unc_embedding": nrm((WIDTH,), scale),
        "positional_embedding": nrm((SEQ, WIDTH), scale),
        "ln_pre_w": jnp.ones((1, WIDTH), jnp.float32),
        "ln_pre_b": jnp.zeros((1, WIDTH), jnp.float32),
        "ln_post_w": jnp.ones((1, WIDTH), jnp.float32),
        "ln_post_b": jnp.zeros((1, WIDTH), jnp.float32),
        "proj": nrm((WIDTH, OUTPUT_DIM), scale),
        "unc_w": nrm((WIDTH, OUTPUT_DIM), scale),           # uncertainty_proj.weight.T
        "unc_b": jnp.full((1, OUTPUT_DIM), INIT_UNC_BIAS, jnp.float32),
    }
    blocks = []
    for _ in range(LAYERS):
        blocks.append({
            "ln1_w": jnp.ones((1, WIDTH), jnp.float32),
            "ln1_b": jnp.zeros((1, WIDTH), jnp.float32),
            "wqkv": nrm((WIDTH, 3 * WIDTH), scale),          # in_proj_weight.T
            "bqkv": nrm((1, 3 * WIDTH), 0.01),
            "wo": nrm((WIDTH, WIDTH), scale),                # out_proj.weight.T
            "bo": nrm((1, WIDTH), 0.01),
            "ln2_w": jnp.ones((1, WIDTH), jnp.float32),
            "ln2_b": jnp.zeros((1, WIDTH), jnp.float32),
            "wfc": nrm((WIDTH, MLP_W), scale),
            "bfc": nrm((1, MLP_W), 0.01),
            "wpr": nrm((MLP_W, WIDTH), MLP_W ** -0.5),
            "bpr": nrm((1, WIDTH), 0.01),
        })
    p["blocks"] = blocks
    return p


# ----------------------------- main ------------------------------------------
if __name__ == "__main__":
    key = jax.random.PRNGKey(0)
    pkey, xkey = jax.random.split(key)
    params = init_params(pkey)
    x = jax.random.normal(xkey, (BATCH, 3, IMAGE_SIZE, IMAGE_SIZE), jnp.float32)

    kparams = pack_params(params)          # one-time weight re-layout (host side)
    out = vit_forward(kparams, x)
    jax.block_until_ready(out)

    ref_mean, ref_std = reference_forward(params, x)
    assert out["mean"].shape == (BATCH, OUTPUT_DIM)
    assert out["std"].shape == (BATCH, OUTPUT_DIM)
    # tolerance covers bf16 MXU operands + tanh-GELU vs the exact f32 reference
    assert np.allclose(np.asarray(out["mean"]), np.asarray(ref_mean), atol=5e-2, rtol=5e-2)
    assert np.allclose(np.asarray(out["std"]), np.asarray(ref_std), atol=5e-2, rtol=5e-2)

    print("KERNEL_OK")
</pallas_src>

<mosaic_0001>
module attributes {stable_mosaic.version = 11 : i64} {
  func.func @fused_vit_kernel(%arg0: i32, %arg1: memref<8x192xf32, #tpu.memory_space<vmem>>, %arg2: memref<12x32xf32, #tpu.memory_space<vmem>>, %arg3: memref<12x12xf32, #tpu.memory_space<vmem>>, %arg4: memref<21x128xf32, #tpu.memory_space<vmem>>, %arg5: memref<192x32xbf16, #tpu.memory_space<vmem>>, %arg6: memref<2x32x256xbf16, #tpu.memory_space<vmem>>, %arg7: memref<2x128x32xbf16, #tpu.memory_space<vmem>>, %arg8: memref<32x32xbf16, #tpu.memory_space<vmem>>, %arg9: memref<2x32xf32, #tpu.memory_space<vmem>>) attributes {dimension_semantics = [#tpu.dimension_semantics<arbitrary>], iteration_bounds = array<i64: 1>, scalar_prefetch = 0 : i64, scratch_operands = 0 : i64, tpu.core_type = #tpu.core_type<tc>, window_params = [{pipeline_mode = #tpu.pipeline_mode<synchronous>, transform_indices = @transform_0, window_bounds = array<i64: 8, 192>}, {pipeline_mode = #tpu.pipeline_mode<synchronous>, transform_indices = @transform_1, window_bounds = array<i64: 12, 32>}, {pipeline_mode = #tpu.pipeline_mode<synchronous>, transform_indices = @transform_2, window_bounds = array<i64: 12, 12>}, {pipeline_mode = #tpu.pipeline_mode<synchronous>, transform_indices = @transform_3, window_bounds = array<i64: 21, 128>}, {pipeline_mode = #tpu.pipeline_mode<synchronous>, transform_indices = @transform_4, window_bounds = array<i64: 192, 32>}, {pipeline_mode = #tpu.pipeline_mode<synchronous>, transform_indices = @transform_5, window_bounds = array<i64: 2, 32, 256>}, {pipeline_mode = #tpu.pipeline_mode<synchronous>, transform_indices = @transform_6, window_bounds = array<i64: 2, 128, 32>}, {pipeline_mode = #tpu.pipeline_mode<synchronous>, transform_indices = @transform_7, window_bounds = array<i64: 32, 32>}, {pipeline_mode = #tpu.pipeline_mode<synchronous>, transform_indices = @transform_8, window_bounds = array<i64: 2, 32>}]} {
    %c0 = arith.constant 0 : index
    %c0_0 = arith.constant 0 : index
    %0 = vector.load %arg4[%c0, %c0_0] : memref<21x128xf32, #tpu.memory_space<vmem>>, vector<21x128xf32>
    %1 = vector.extract_strided_slice %0 {offsets = [0, 0], sizes = [1, 32], strides = [1, 1]} : vector<21x128xf32> to vector<1x32xf32>
    %2 = vector.extract_strided_slice %0 {offsets = [1, 0], sizes = [1, 32], strides = [1, 1]} : vector<21x128xf32> to vector<1x32xf32>
    %3 = vector.extract_strided_slice %0 {offsets = [2, 0], sizes = [1, 32], strides = [1, 1]} : vector<21x128xf32> to vector<1x32xf32>
    %4 = vector.extract_strided_slice %0 {offsets = [3, 0], sizes = [1, 32], strides = [1, 1]} : vector<21x128xf32> to vector<1x32xf32>
    %5 = vector.extract_strided_slice %0 {offsets = [4, 0], sizes = [1, 16], strides = [1, 1]} : vector<21x128xf32> to vector<1x16xf32>
    %c0_1 = arith.constant 0 : index
    %c0_2 = arith.constant 0 : index
    %6 = vector.load %arg3[%c0_1, %c0_2] : memref<12x12xf32, #tpu.memory_space<vmem>>, vector<12x12xf32>
    %c0_3 = arith.constant 0 : index
    %c0_4 = arith.constant 0 : index
    %7 = vector.load %arg1[%c0_3, %c0_4] : memref<8x192xf32, #tpu.memory_space<vmem>>, vector<8x192xf32>
    %8 = arith.truncf %7 : vector<8x192xf32> to vector<8x192xbf16>
    %c0_5 = arith.constant 0 : index
    %c0_6 = arith.constant 0 : index
    %9 = vector.load %arg5[%c0_5, %c0_6] : memref<192x32xbf16, #tpu.memory_space<vmem>>, vector<192x32xbf16>
    %cst = arith.constant dense<0.000000e+00> : vector<8x32xf32>
    %10 = tpu.matmul %8, %9, %cst {dimension_numbers = #tpu.dot_dimension_numbers<[1], [0], [0], [1], [0, 0, 1, 1], [], []>} : vector<8x192xbf16>, vector<192x32xbf16>, vector<8x32xf32> -> vector<8x32xf32>
    %c0_7 = arith.constant 0 : index
    %c0_8 = arith.constant 0 : index
    %11 = vector.load %arg2[%c0_7, %c0_8] : memref<12x32xf32, #tpu.memory_space<vmem>>, vector<12x32xf32>
    %12 = vector.extract_strided_slice %11 {offsets = [0, 0], sizes = [4, 32], strides = [1, 1]} : vector<12x32xf32> to vector<4x32xf32>
    %13 = vector.extract_strided_slice %11 {offsets = [4, 0], sizes = [8, 32], strides = [1, 1]} : vector<12x32xf32> to vector<8x32xf32>
    %14 = arith.addf %13, %10 : vector<8x32xf32>
    %15 = tpu.concatenate %12, %14 in 0 : vector<4x32xf32>, vector<8x32xf32> -> vector<12x32xf32>
    %cst_9 = arith.constant dense<0.000000e+00> : vector<12xf32>
    %16 = vector.multi_reduction <add>, %15, %cst_9 [1] : vector<12x32xf32> to vector<12xf32>
    %17 = vector.shape_cast %16 : vector<12xf32> to vector<12x1xf32>
    %cst_10 = arith.constant 3.200000e+01 : f32
    %18 = vector.broadcast %cst_10 : f32 to vector<12x1xf32>
    %19 = arith.divf %17, %18 : vector<12x1xf32>
    %20 = vector.broadcast %19 : vector<12x1xf32> to vector<12x32xf32>
    %21 = arith.subf %15, %20 : vector<12x32xf32>
    %22 = arith.mulf %21, %21 : vector<12x32xf32>
    %cst_11 = arith.constant dense<0.000000e+00> : vector<12xf32>
    %23 = vector.multi_reduction <add>, %22, %cst_11 [1] : vector<12x32xf32> to vector<12xf32>
    %24 = vector.shape_cast %23 : vector<12xf32> to vector<12x1xf32>
    %cst_12 = arith.constant 3.200000e+01 : f32
    %25 = vector.broadcast %cst_12 : f32 to vector<12x1xf32>
    %26 = arith.divf %24, %25 : vector<12x1xf32>
    %27 = vector.broadcast %19 : vector<12x1xf32> to vector<12x32xf32>
    %28 = arith.subf %15, %27 : vector<12x32xf32>
    %cst_13 = arith.constant 9.99999974E-6 : f32
    %29 = vector.broadcast %cst_13 : f32 to vector<12x1xf32>
    %30 = arith.addf %26, %29 : vector<12x1xf32>
    %31 = math.rsqrt %30 : vector<12x1xf32>
    %32 = vector.broadcast %31 : vector<12x1xf32> to vector<12x32xf32>
    %33 = arith.mulf %28, %32 : vector<12x32xf32>
    %34 = vector.broadcast %1 : vector<1x32xf32> to vector<12x32xf32>
    %35 = arith.mulf %33, %34 : vector<12x32xf32>
    %36 = vector.broadcast %2 : vector<1x32xf32> to vector<12x32xf32>
    %37 = arith.addf %35, %36 : vector<12x32xf32>
    %38 = vector.extract_strided_slice %0 {offsets = [5, 0], sizes = [1, 32], strides = [1, 1]} : vector<21x128xf32> to vector<1x32xf32>
    %39 = vector.extract_strided_slice %0 {offsets = [6, 0], sizes = [1, 32], strides = [1, 1]} : vector<21x128xf32> to vector<1x32xf32>
    %40 = vector.extract_strided_slice %0 {offsets = [7, 0], sizes = [1, 96], strides = [1, 1]} : vector<21x128xf32> to vector<1x96xf32>
    %41 = vector.extract_strided_slice %0 {offsets = [8, 0], sizes = [1, 32], strides = [1, 1]} : vector<21x128xf32> to vector<1x32xf32>
    %42 = vector.extract_strided_slice %0 {offsets = [9, 0], sizes = [1, 32], strides = [1, 1]} : vector<21x128xf32> to vector<1x32xf32>
    %43 = vector.extract_strided_slice %0 {offsets = [10, 0], sizes = [1, 32], strides = [1, 1]} : vector<21x128xf32> to vector<1x32xf32>
    %44 = vector.extract_strided_slice %0 {offsets = [11, 0], sizes = [1, 128], strides = [1, 1]} : vector<21x128xf32> to vector<1x128xf32>
    %45 = vector.extract_strided_slice %0 {offsets = [12, 0], sizes = [1, 32], strides = [1, 1]} : vector<21x128xf32> to vector<1x32xf32>
    %c0_14 = arith.constant 0 : index
    %c0_15 = arith.constant 0 : index
    %c0_16 = arith.constant 0 : index
    %46 = vector.load %arg6[%c0_14, %c0_15, %c0_16] : memref<2x32x256xbf16, #tpu.memory_space<vmem>>, vector<1x32x256xbf16>
    %47 = vector.shape_cast %46 : vector<1x32x256xbf16> to vector<32x256xbf16>
    %48 = vector.extract_strided_slice %47 {offsets = [0, 0], sizes = [32, 96], strides = [1, 1]} : vector<32x256xbf16> to vector<32x96xbf16>
    %49 = vector.extract_strided_slice %47 {offsets = [0, 96], sizes = [32, 32], strides = [1, 1]} : vector<32x256xbf16> to vector<32x32xbf16>
    %50 = vector.extract_strided_slice %47 {offsets = [0, 128], sizes = [32, 128], strides = [1, 1]} : vector<32x256xbf16> to vector<32x128xbf16>
    %c0_17 = arith.constant 0 : index
    %c0_18 = arith.constant 0 : index
    %c0_19 = arith.constant 0 : index
    %51 = vector.load %arg7[%c0_17, %c0_18, %c0_19] : memref<2x128x32xbf16, #tpu.memory_space<vmem>>, vector<1x128x32xbf16>
    %52 = vector.shape_cast %51 : vector<1x128x32xbf16> to vector<128x32xbf16>
    %cst_20 = arith.constant dense<0.000000e+00> : vector<12xf32>
    %53 = vector.multi_reduction <add>, %37, %cst_20 [1] : vector<12x32xf32> to vector<12xf32>
    %54 = vector.shape_cast %53 : vector<12xf32> to vector<12x1xf32>
    %cst_21 = arith.constant 3.200000e+01 : f32
    %55 = vector.broadcast %cst_21 : f32 to vector<12x1xf32>
    %56 = arith.divf %54, %55 : vector<12x1xf32>
    %57 = vector.broadcast %56 : vector<12x1xf32> to vector<12x32xf32>
    %58 = arith.subf %37, %57 : vector<12x32xf32>
    %59 = arith.mulf %58, %58 : vector<12x32xf32>
    %cst_22 = arith.constant dense<0.000000e+00> : vector<12xf32>
    %60 = vector.multi_reduction <add>, %59, %cst_22 [1] : vector<12x32xf32> to vector<12xf32>
    %61 = vector.shape_cast %60 : vector<12xf32> to vector<12x1xf32>
    %cst_23 = arith.constant 3.200000e+01 : f32
    %62 = vector.broadcast %cst_23 : f32 to vector<12x1xf32>
    %63 = arith.divf %61, %62 : vector<12x1xf32>
    %64 = vector.broadcast %56 : vector<12x1xf32> to vector<12x32xf32>
    %65 = arith.subf %37, %64 : vector<12x32xf32>
    %cst_24 = arith.constant 9.99999974E-6 : f32
    %66 = vector.broadcast %cst_24 : f32 to vector<12x1xf32>
    %67 = arith.addf %63, %66 : vector<12x1xf32>
    %68 = math.rsqrt %67 : vector<12x1xf32>
    %69 = vector.broadcast %68 : vector<12x1xf32> to vector<12x32xf32>
    %70 = arith.mulf %65, %69 : vector<12x32xf32>
    %71 = vector.broadcast %38 : vector<1x32xf32> to vector<12x32xf32>
    %72 = arith.mulf %70, %71 : vector<12x32xf32>
    %73 = vector.broadcast %39 : vector<1x32xf32> to vector<12x32xf32>
    %74 = arith.addf %72, %73 : vector<12x32xf32>
    %75 = arith.truncf %74 : vector<12x32xf32> to vector<12x32xbf16>
    %cst_25 = arith.constant dense<0.000000e+00> : vector<12x96xf32>
    %76 = tpu.matmul %75, %48, %cst_25 {dimension_numbers = #tpu.dot_dimension_numbers<[1], [0], [0], [1], [0, 0, 1, 1], [], []>} : vector<12x32xbf16>, vector<32x96xbf16>, vector<12x96xf32> -> vector<12x96xf32>
    %77 = vector.broadcast %40 : vector<1x96xf32> to vector<12x96xf32>
    %78 = arith.addf %76, %77 : vector<12x96xf32>
    %79 = vector.extract_strided_slice %78 {offsets = [0, 0], sizes = [12, 16], strides = [1, 1]} : vector<12x96xf32> to vector<12x16xf32>
    %80 = arith.truncf %79 : vector<12x16xf32> to vector<12x16xbf16>
    %81 = vector.extract_strided_slice %78 {offsets = [0, 32], sizes = [12, 16], strides = [1, 1]} : vector<12x96xf32> to vector<12x16xf32>
    %82 = arith.truncf %81 : vector<12x16xf32> to vector<12x16xbf16>
    %83 = vector.extract_strided_slice %78 {offsets = [0, 64], sizes = [12, 16], strides = [1, 1]} : vector<12x96xf32> to vector<12x16xf32>
    %84 = arith.truncf %83 : vector<12x16xf32> to vector<12x16xbf16>
    %cst_26 = arith.constant dense<0.000000e+00> : vector<12x12xf32>
    %85 = tpu.matmul %80, %82, %cst_26 {dimension_numbers = #tpu.dot_dimension_numbers<[1], [1], [0], [0], [0, 0, 1, 0], [], []>} : vector<12x16xbf16>, vector<12x16xbf16>, vector<12x12xf32> -> vector<12x12xf32>
    %cst_27 = arith.constant 2.500000e-01 : f32
    %86 = vector.broadcast %cst_27 : f32 to vector<12x12xf32>
    %87 = arith.mulf %85, %86 : vector<12x12xf32>
    %88 = arith.addf %87, %6 : vector<12x12xf32>
    %cst_28 = arith.constant dense<0xFF800000> : vector<12xf32>
    %89 = vector.multi_reduction <maximumf>, %88, %cst_28 [1] : vector<12x12xf32> to vector<12xf32>
    %90 = vector.shape_cast %89 : vector<12xf32> to vector<12x1xf32>
    %91 = vector.broadcast %90 : vector<12x1xf32> to vector<12x12xf32>
    %92 = arith.subf %88, %91 : vector<12x12xf32>
    %93 = math.exp %92 : vector<12x12xf32>
    %cst_29 = arith.constant dense<0.000000e+00> : vector<12xf32>
    %94 = vector.multi_reduction <add>, %93, %cst_29 [1] : vector<12x12xf32> to vector<12xf32>
    %95 = vector.shape_cast %94 : vector<12xf32> to vector<12x1xf32>
    %96 = vector.broadcast %95 : vector<12x1xf32> to vector<12x12xf32>
    %97 = arith.divf %93, %96 : vector<12x12xf32>
    %98 = arith.truncf %97 : vector<12x12xf32> to vector<12x12xbf16>
    %cst_30 = arith.constant dense<0.000000e+00> : vector<12x16xf32>
    %99 = tpu.matmul %98, %84, %cst_30 {dimension_numbers = #tpu.dot_dimension_numbers<[1], [0], [0], [1], [0, 0, 1, 1], [], []>} : vector<12x12xbf16>, vector<12x16xbf16>, vector<12x16xf32> -> vector<12x16xf32>
    %100 = vector.extract_strided_slice %78 {offsets = [0, 16], sizes = [12, 16], strides = [1, 1]} : vector<12x96xf32> to vector<12x16xf32>
    %101 = arith.truncf %100 : vector<12x16xf32> to vector<12x16xbf16>
    %102 = vector.extract_strided_slice %78 {offsets = [0, 48], sizes = [12, 16], strides = [1, 1]} : vector<12x96xf32> to vector<12x16xf32>
    %103 = arith.truncf %102 : vector<12x16xf32> to vector<12x16xbf16>
    %104 = vector.extract_strided_slice %78 {offsets = [0, 80], sizes = [12, 16], strides = [1, 1]} : vector<12x96xf32> to vector<12x16xf32>
    %105 = arith.truncf %104 : vector<12x16xf32> to vector<12x16xbf16>
    %cst_31 = arith.constant dense<0.000000e+00> : vector<12x12xf32>
    %106 = tpu.matmul %101, %103, %cst_31 {dimension_numbers = #tpu.dot_dimension_numbers<[1], [1], [0], [0], [0, 0, 1, 0], [], []>} : vector<12x16xbf16>, vector<12x16xbf16>, vector<12x12xf32> -> vector<12x12xf32>
    %cst_32 = arith.constant 2.500000e-01 : f32
    %107 = vector.broadcast %cst_32 : f32 to vector<12x12xf32>
    %108 = arith.mulf %106, %107 : vector<12x12xf32>
    %109 = arith.addf %108, %6 : vector<12x12xf32>
    %cst_33 = arith.constant dense<0xFF800000> : vector<12xf32>
    %110 = vector.multi_reduction <maximumf>, %109, %cst_33 [1] : vector<12x12xf32> to vector<12xf32>
    %111 = vector.shape_cast %110 : vector<12xf32> to vector<12x1xf32>
    %112 = vector.broadcast %111 : vector<12x1xf32> to vector<12x12xf32>
    %113 = arith.subf %109, %112 : vector<12x12xf32>
    %114 = math.exp %113 : vector<12x12xf32>
    %cst_34 = arith.constant dense<0.000000e+00> : vector<12xf32>
    %115 = vector.multi_reduction <add>, %114, %cst_34 [1] : vector<12x12xf32> to vector<12xf32>
    %116 = vector.shape_cast %115 : vector<12xf32> to vector<12x1xf32>
    %117 = vector.broadcast %116 : vector<12x1xf32> to vector<12x12xf32>
    %118 = arith.divf %114, %117 : vector<12x12xf32>
    %119 = arith.truncf %118 : vector<12x12xf32> to vector<12x12xbf16>
    %cst_35 = arith.constant dense<0.000000e+00> : vector<12x16xf32>
    %120 = tpu.matmul %119, %105, %cst_35 {dimension_numbers = #tpu.dot_dimension_numbers<[1], [0], [0], [1], [0, 0, 1, 1], [], []>} : vector<12x12xbf16>, vector<12x16xbf16>, vector<12x16xf32> -> vector<12x16xf32>
    %121 = tpu.concatenate %99, %120 in 1 : vector<12x16xf32>, vector<12x16xf32> -> vector<12x32xf32>
    %122 = arith.truncf %121 : vector<12x32xf32> to vector<12x32xbf16>
    %cst_36 = arith.constant dense<0.000000e+00> : vector<12x32xf32>
    %123 = tpu.matmul %122, %49, %cst_36 {dimension_numbers = #tpu.dot_dimension_numbers<[1], [0], [0], [1], [0, 0, 1, 1], [], []>} : vector<12x32xbf16>, vector<32x32xbf16>, vector<12x32xf32> -> vector<12x32xf32>
    %124 = arith.addf %37, %123 : vector<12x32xf32>
    %125 = vector.broadcast %41 : vector<1x32xf32> to vector<12x32xf32>
    %126 = arith.addf %124, %125 : vector<12x32xf32>
    %cst_37 = arith.constant dense<0.000000e+00> : vector<12xf32>
    %127 = vector.multi_reduction <add>, %126, %cst_37 [1] : vector<12x32xf32> to vector<12xf32>
    %128 = vector.shape_cast %127 : vector<12xf32> to vector<12x1xf32>
    %cst_38 = arith.constant 3.200000e+01 : f32
    %129 = vector.broadcast %cst_38 : f32 to vector<12x1xf32>
    %130 = arith.divf %128, %129 : vector<12x1xf32>
    %131 = vector.broadcast %130 : vector<12x1xf32> to vector<12x32xf32>
    %132 = arith.subf %126, %131 : vector<12x32xf32>
    %133 = arith.mulf %132, %132 : vector<12x32xf32>
    %cst_39 = arith.constant dense<0.000000e+00> : vector<12xf32>
    %134 = vector.multi_reduction <add>, %133, %cst_39 [1] : vector<12x32xf32> to vector<12xf32>
    %135 = vector.shape_cast %134 : vector<12xf32> to vector<12x1xf32>
    %cst_40 = arith.constant 3.200000e+01 : f32
    %136 = vector.broadcast %cst_40 : f32 to vector<12x1xf32>
    %137 = arith.divf %135, %136 : vector<12x1xf32>
    %138 = vector.broadcast %130 : vector<12x1xf32> to vector<12x32xf32>
    %139 = arith.subf %126, %138 : vector<12x32xf32>
    %cst_41 = arith.constant 9.99999974E-6 : f32
    %140 = vector.broadcast %cst_41 : f32 to vector<12x1xf32>
    %141 = arith.addf %137, %140 : vector<12x1xf32>
    %142 = math.rsqrt %141 : vector<12x1xf32>
    %143 = vector.broadcast %142 : vector<12x1xf32> to vector<12x32xf32>
    %144 = arith.mulf %139, %143 : vector<12x32xf32>
    %145 = vector.broadcast %42 : vector<1x32xf32> to vector<12x32xf32>
    %146 = arith.mulf %144, %145 : vector<12x32xf32>
    %147 = vector.broadcast %43 : vector<1x32xf32> to vector<12x32xf32>
    %148 = arith.addf %146, %147 : vector<12x32xf32>
    %149 = arith.truncf %148 : vector<12x32xf32> to vector<12x32xbf16>
    %cst_42 = arith.constant dense<0.000000e+00> : vector<12x128xf32>
    %150 = tpu.matmul %149, %50, %cst_42 {dimension_numbers = #tpu.dot_dimension_numbers<[1], [0], [0], [1], [0, 0, 1, 1], [], []>} : vector<12x32xbf16>, vector<32x128xbf16>, vector<12x128xf32> -> vector<12x128xf32>
    %151 = vector.broadcast %44 : vector<1x128xf32> to vector<12x128xf32>
    %152 = arith.addf %150, %151 : vector<12x128xf32>
    %cst_43 = arith.constant 5.000000e-01 : f32
    %153 = vector.broadcast %cst_43 : f32 to vector<12x128xf32>
    %154 = arith.mulf %153, %152 : vector<12x128xf32>
    %cst_44 = arith.constant 4.471500e-02 : f32
    %155 = vector.broadcast %cst_44 : f32 to vector<12x128xf32>
    %156 = arith.mulf %155, %152 : vector<12x128xf32>
    %157 = arith.mulf %156, %152 : vector<12x128xf32>
    %158 = arith.mulf %157, %152 : vector<12x128xf32>
    %159 = arith.addf %152, %158 : vector<12x128xf32>
    %cst_45 = arith.constant 0.797884583 : f32
    %160 = vector.broadcast %cst_45 : f32 to vector<12x128xf32>
    %161 = arith.mulf %160, %159 : vector<12x128xf32>
    %162 = math.tanh %161 : vector<12x128xf32>
    %cst_46 = arith.constant 1.000000e+00 : f32
    %163 = vector.broadcast %cst_46 : f32 to vector<12x128xf32>
    %164 = arith.addf %163, %162 : vector<12x128xf32>
    %165 = arith.mulf %154, %164 : vector<12x128xf32>
    %166 = arith.truncf %165 : vector<12x128xf32> to vector<12x128xbf16>
    %cst_47 = arith.constant dense<0.000000e+00> : vector<12x32xf32>
    %167 = tpu.matmul %166, %52, %cst_47 {dimension_numbers = #tpu.dot_dimension_numbers<[1], [0], [0], [1], [0, 0, 1, 1], [], []>} : vector<12x128xbf16>, vector<128x32xbf16>, vector<12x32xf32> -> vector<12x32xf32>
    %168 = arith.addf %126, %167 : vector<12x32xf32>
    %169 = vector.broadcast %45 : vector<1x32xf32> to vector<12x32xf32>
    %170 = arith.addf %168, %169 : vector<12x32xf32>
    %171 = vector.extract_strided_slice %0 {offsets = [13, 0], sizes = [1, 32], strides = [1, 1]} : vector<21x128xf32> to vector<1x32xf32>
    %172 = vector.extract_strided_slice %0 {offsets = [14, 0], sizes = [1, 32], strides = [1, 1]} : vector<21x128xf32> to vector<1x32xf32>
    %173 = vector.extract_strided_slice %0 {offsets = [15, 0], sizes = [1, 96], strides = [1, 1]} : vector<21x128xf32> to vector<1x96xf32>
    %174 = vector.extract_strided_slice %0 {offsets = [16, 0], sizes = [1, 32], strides = [1, 1]} : vector<21x128xf32> to vector<1x32xf32>
    %175 = vector.extract_strided_slice %0 {offsets = [17, 0], sizes = [1, 32], strides = [1, 1]} : vector<21x128xf32> to vector<1x32xf32>
    %176 = vector.extract_strided_slice %0 {offsets = [18, 0], sizes = [1, 32], strides = [1, 1]} : vector<21x128xf32> to vector<1x32xf32>
    %177 = vector.extract_strided_slice %0 {offsets = [19, 0], sizes = [1, 128], strides = [1, 1]} : vector<21x128xf32> to vector<1x128xf32>
    %178 = vector.extract_strided_slice %0 {offsets = [20, 0], sizes = [1, 32], strides = [1, 1]} : vector<21x128xf32> to vector<1x32xf32>
    %c1 = arith.constant 1 : index
    %c0_48 = arith.constant 0 : index
    %c0_49 = arith.constant 0 : index
    %179 = vector.load %arg6[%c1, %c0_48, %c0_49] : memref<2x32x256xbf16, #tpu.memory_space<vmem>>, vector<1x32x256xbf16>
    %180 = vector.shape_cast %179 : vector<1x32x256xbf16> to vector<32x256xbf16>
    %181 = vector.extract_strided_slice %180 {offsets = [0, 0], sizes = [32, 96], strides = [1, 1]} : vector<32x256xbf16> to vector<32x96xbf16>
    %182 = vector.extract_strided_slice %180 {offsets = [0, 96], sizes = [32, 32], strides = [1, 1]} : vector<32x256xbf16> to vector<32x32xbf16>
    %183 = vector.extract_strided_slice %180 {offsets = [0, 128], sizes = [32, 128], strides = [1, 1]} : vector<32x256xbf16> to vector<32x128xbf16>
    %c1_50 = arith.constant 1 : index
    %c0_51 = arith.constant 0 : index
    %c0_52 = arith.constant 0 : index
    %184 = vector.load %arg7[%c1_50, %c0_51, %c0_52] : memref<2x128x32xbf16, #tpu.memory_space<vmem>>, vector<1x128x32xbf16>
    %185 = vector.shape_cast %184 : vector<1x128x32xbf16> to vector<128x32xbf16>
    %cst_53 = arith.constant dense<0.000000e+00> : vector<12xf32>
    %186 = vector.multi_reduction <add>, %170, %cst_53 [1] : vector<12x32xf32> to vector<12xf32>
    %187 = vector.shape_cast %186 : vector<12xf32> to vector<12x1xf32>
    %cst_54 = arith.constant 3.200000e+01 : f32
    %188 = vector.broadcast %cst_54 : f32 to vector<12x1xf32>
    %189 = arith.divf %187, %188 : vector<12x1xf32>
    %190 = vector.broadcast %189 : vector<12x1xf32> to vector<12x32xf32>
    %191 = arith.subf %170, %190 : vector<12x32xf32>
    %192 = arith.mulf %191, %191 : vector<12x32xf32>
    %cst_55 = arith.constant dense<0.000000e+00> : vector<12xf32>
    %193 = vector.multi_reduction <add>, %192, %cst_55 [1] : vector<12x32xf32> to vector<12xf32>
    %194 = vector.shape_cast %193 : vector<12xf32> to vector<12x1xf32>
    %cst_56 = arith.constant 3.200000e+01 : f32
    %195 = vector.broadcast %cst_56 : f32 to vector<12x1xf32>
    %196 = arith.divf %194, %195 : vector<12x1xf32>
    %197 = vector.broadcast %189 : vector<12x1xf32> to vector<12x32xf32>
    %198 = arith.subf %170, %197 : vector<12x32xf32>
    %cst_57 = arith.constant 9.99999974E-6 : f32
    %199 = vector.broadcast %cst_57 : f32 to vector<12x1xf32>
    %200 = arith.addf %196, %199 : vector<12x1xf32>
    %201 = math.rsqrt %200 : vector<12x1xf32>
    %202 = vector.broadcast %201 : vector<12x1xf32> to vector<12x32xf32>
    %203 = arith.mulf %198, %202 : vector<12x32xf32>
    %204 = vector.broadcast %171 : vector<1x32xf32> to vector<12x32xf32>
    %205 = arith.mulf %203, %204 : vector<12x32xf32>
    %206 = vector.broadcast %172 : vector<1x32xf32> to vector<12x32xf32>
    %207 = arith.addf %205, %206 : vector<12x32xf32>
    %208 = arith.truncf %207 : vector<12x32xf32> to vector<12x32xbf16>
    %cst_58 = arith.constant dense<0.000000e+00> : vector<12x96xf32>
    %209 = tpu.matmul %208, %181, %cst_58 {dimension_numbers = #tpu.dot_dimension_numbers<[1], [0], [0], [1], [0, 0, 1, 1], [], []>} : vector<12x32xbf16>, vector<32x96xbf16>, vector<12x96xf32> -> vector<12x96xf32>
    %210 = vector.broadcast %173 : vector<1x96xf32> to vector<12x96xf32>
    %211 = arith.addf %209, %210 : vector<12x96xf32>
    %212 = vector.extract_strided_slice %211 {offsets = [0, 0], sizes = [12, 16], strides = [1, 1]} : vector<12x96xf32> to vector<12x16xf32>
    %213 = arith.truncf %212 : vector<12x16xf32> to vector<12x16xbf16>
    %214 = vector.extract_strided_slice %211 {offsets = [0, 32], sizes = [12, 16], strides = [1, 1]} : vector<12x96xf32> to vector<12x16xf32>
    %215 = arith.truncf %214 : vector<12x16xf32> to vector<12x16xbf16>
    %216 = vector.extract_strided_slice %211 {offsets = [0, 64], sizes = [12, 16], strides = [1, 1]} : vector<12x96xf32> to vector<12x16xf32>
    %217 = arith.truncf %216 : vector<12x16xf32> to vector<12x16xbf16>
    %cst_59 = arith.constant dense<0.000000e+00> : vector<12x12xf32>
    %218 = tpu.matmul %213, %215, %cst_59 {dimension_numbers = #tpu.dot_dimension_numbers<[1], [1], [0], [0], [0, 0, 1, 0], [], []>} : vector<12x16xbf16>, vector<12x16xbf16>, vector<12x12xf32> -> vector<12x12xf32>
    %cst_60 = arith.constant 2.500000e-01 : f32
    %219 = vector.broadcast %cst_60 : f32 to vector<12x12xf32>
    %220 = arith.mulf %218, %219 : vector<12x12xf32>
    %221 = arith.addf %220, %6 : vector<12x12xf32>
    %cst_61 = arith.constant dense<0xFF800000> : vector<12xf32>
    %222 = vector.multi_reduction <maximumf>, %221, %cst_61 [1] : vector<12x12xf32> to vector<12xf32>
    %223 = vector.shape_cast %222 : vector<12xf32> to vector<12x1xf32>
    %224 = vector.broadcast %223 : vector<12x1xf32> to vector<12x12xf32>
    %225 = arith.subf %221, %224 : vector<12x12xf32>
    %226 = math.exp %225 : vector<12x12xf32>
    %cst_62 = arith.constant dense<0.000000e+00> : vector<12xf32>
    %227 = vector.multi_reduction <add>, %226, %cst_62 [1] : vector<12x12xf32> to vector<12xf32>
    %228 = vector.shape_cast %227 : vector<12xf32> to vector<12x1xf32>
    %229 = vector.broadcast %228 : vector<12x1xf32> to vector<12x12xf32>
    %230 = arith.divf %226, %229 : vector<12x12xf32>
    %231 = arith.truncf %230 : vector<12x12xf32> to vector<12x12xbf16>
    %cst_63 = arith.constant dense<0.000000e+00> : vector<12x16xf32>
    %232 = tpu.matmul %231, %217, %cst_63 {dimension_numbers = #tpu.dot_dimension_numbers<[1], [0], [0], [1], [0, 0, 1, 1], [], []>} : vector<12x12xbf16>, vector<12x16xbf16>, vector<12x16xf32> -> vector<12x16xf32>
    %233 = vector.extract_strided_slice %211 {offsets = [0, 16], sizes = [12, 16], strides = [1, 1]} : vector<12x96xf32> to vector<12x16xf32>
    %234 = arith.truncf %233 : vector<12x16xf32> to vector<12x16xbf16>
    %235 = vector.extract_strided_slice %211 {offsets = [0, 48], sizes = [12, 16], strides = [1, 1]} : vector<12x96xf32> to vector<12x16xf32>
    %236 = arith.truncf %235 : vector<12x16xf32> to vector<12x16xbf16>
    %237 = vector.extract_strided_slice %211 {offsets = [0, 80], sizes = [12, 16], strides = [1, 1]} : vector<12x96xf32> to vector<12x16xf32>
    %238 = arith.truncf %237 : vector<12x16xf32> to vector<12x16xbf16>
    %cst_64 = arith.constant dense<0.000000e+00> : vector<12x12xf32>
    %239 = tpu.matmul %234, %236, %cst_64 {dimension_numbers = #tpu.dot_dimension_numbers<[1], [1], [0], [0], [0, 0, 1, 0], [], []>} : vector<12x16xbf16>, vector<12x16xbf16>, vector<12x12xf32> -> vector<12x12xf32>
    %cst_65 = arith.constant 2.500000e-01 : f32
    %240 = vector.broadcast %cst_65 : f32 to vector<12x12xf32>
    %241 = arith.mulf %239, %240 : vector<12x12xf32>
    %242 = arith.addf %241, %6 : vector<12x12xf32>
    %cst_66 = arith.constant dense<0xFF800000> : vector<12xf32>
    %243 = vector.multi_reduction <maximumf>, %242, %cst_66 [1] : vector<12x12xf32> to vector<12xf32>
    %244 = vector.shape_cast %243 : vector<12xf32> to vector<12x1xf32>
    %245 = vector.broadcast %244 : vector<12x1xf32> to vector<12x12xf32>
    %246 = arith.subf %242, %245 : vector<12x12xf32>
    %247 = math.exp %246 : vector<12x12xf32>
    %cst_67 = arith.constant dense<0.000000e+00> : vector<12xf32>
    %248 = vector.multi_reduction <add>, %247, %cst_67 [1] : vector<12x12xf32> to vector<12xf32>
    %249 = vector.shape_cast %248 : vector<12xf32> to vector<12x1xf32>
    %250 = vector.broadcast %249 : vector<12x1xf32> to vector<12x12xf32>
    %251 = arith.divf %247, %250 : vector<12x12xf32>
    %252 = arith.truncf %251 : vector<12x12xf32> to vector<12x12xbf16>
    %cst_68 = arith.constant dense<0.000000e+00> : vector<12x16xf32>
    %253 = tpu.matmul %252, %238, %cst_68 {dimension_numbers = #tpu.dot_dimension_numbers<[1], [0], [0], [1], [0, 0, 1, 1], [], []>} : vector<12x12xbf16>, vector<12x16xbf16>, vector<12x16xf32> -> vector<12x16xf32>
    %254 = tpu.concatenate %232, %253 in 1 : vector<12x16xf32>, vector<12x16xf32> -> vector<12x32xf32>
    %255 = arith.truncf %254 : vector<12x32xf32> to vector<12x32xbf16>
    %cst_69 = arith.constant dense<0.000000e+00> : vector<12x32xf32>
    %256 = tpu.matmul %255, %182, %cst_69 {dimension_numbers = #tpu.dot_dimension_numbers<[1], [0], [0], [1], [0, 0, 1, 1], [], []>} : vector<12x32xbf16>, vector<32x32xbf16>, vector<12x32xf32> -> vector<12x32xf32>
    %257 = arith.addf %170, %256 : vector<12x32xf32>
    %258 = vector.broadcast %174 : vector<1x32xf32> to vector<12x32xf32>
    %259 = arith.addf %257, %258 : vector<12x32xf32>
    %cst_70 = arith.constant dense<0.000000e+00> : vector<12xf32>
    %260 = vector.multi_reduction <add>, %259, %cst_70 [1] : vector<12x32xf32> to vector<12xf32>
    %261 = vector.shape_cast %260 : vector<12xf32> to vector<12x1xf32>
    %cst_71 = arith.constant 3.200000e+01 : f32
    %262 = vector.broadcast %cst_71 : f32 to vector<12x1xf32>
    %263 = arith.divf %261, %262 : vector<12x1xf32>
    %264 = vector.broadcast %263 : vector<12x1xf32> to vector<12x32xf32>
    %265 = arith.subf %259, %264 : vector<12x32xf32>
    %266 = arith.mulf %265, %265 : vector<12x32xf32>
    %cst_72 = arith.constant dense<0.000000e+00> : vector<12xf32>
    %267 = vector.multi_reduction <add>, %266, %cst_72 [1] : vector<12x32xf32> to vector<12xf32>
    %268 = vector.shape_cast %267 : vector<12xf32> to vector<12x1xf32>
    %cst_73 = arith.constant 3.200000e+01 : f32
    %269 = vector.broadcast %cst_73 : f32 to vector<12x1xf32>
    %270 = arith.divf %268, %269 : vector<12x1xf32>
    %271 = vector.broadcast %263 : vector<12x1xf32> to vector<12x32xf32>
    %272 = arith.subf %259, %271 : vector<12x32xf32>
    %cst_74 = arith.constant 9.99999974E-6 : f32
    %273 = vector.broadcast %cst_74 : f32 to vector<12x1xf32>
    %274 = arith.addf %270, %273 : vector<12x1xf32>
    %275 = math.rsqrt %274 : vector<12x1xf32>
    %276 = vector.broadcast %275 : vector<12x1xf32> to vector<12x32xf32>
    %277 = arith.mulf %272, %276 : vector<12x32xf32>
    %278 = vector.broadcast %175 : vector<1x32xf32> to vector<12x32xf32>
    %279 = arith.mulf %277, %278 : vector<12x32xf32>
    %280 = vector.broadcast %176 : vector<1x32xf32> to vector<12x32xf32>
    %281 = arith.addf %279, %280 : vector<12x32xf32>
    %282 = arith.truncf %281 : vector<12x32xf32> to vector<12x32xbf16>
    %cst_75 = arith.constant dense<0.000000e+00> : vector<12x128xf32>
    %283 = tpu.matmul %282, %183, %cst_75 {dimension_numbers = #tpu.dot_dimension_numbers<[1], [0], [0], [1], [0, 0, 1, 1], [], []>} : vector<12x32xbf16>, vector<32x128xbf16>, vector<12x128xf32> -> vector<12x128xf32>
    %284 = vector.broadcast %177 : vector<1x128xf32> to vector<12x128xf32>
    %285 = arith.addf %283, %284 : vector<12x128xf32>
    %cst_76 = arith.constant 5.000000e-01 : f32
    %286 = vector.broadcast %cst_76 : f32 to vector<12x128xf32>
    %287 = arith.mulf %286, %285 : vector<12x128xf32>
    %cst_77 = arith.constant 4.471500e-02 : f32
    %288 = vector.broadcast %cst_77 : f32 to vector<12x128xf32>
    %289 = arith.mulf %288, %285 : vector<12x128xf32>
    %290 = arith.mulf %289, %285 : vector<12x128xf32>
    %291 = arith.mulf %290, %285 : vector<12x128xf32>
    %292 = arith.addf %285, %291 : vector<12x128xf32>
    %cst_78 = arith.constant 0.797884583 : f32
    %293 = vector.broadcast %cst_78 : f32 to vector<12x128xf32>
    %294 = arith.mulf %293, %292 : vector<12x128xf32>
    %295 = math.tanh %294 : vector<12x128xf32>
    %cst_79 = arith.constant 1.000000e+00 : f32
    %296 = vector.broadcast %cst_79 : f32 to vector<12x128xf32>
    %297 = arith.addf %296, %295 : vector<12x128xf32>
    %298 = arith.mulf %287, %297 : vector<12x128xf32>
    %299 = arith.truncf %298 : vector<12x128xf32> to vector<12x128xbf16>
    %cst_80 = arith.constant dense<0.000000e+00> : vector<12x32xf32>
    %300 = tpu.matmul %299, %185, %cst_80 {dimension_numbers = #tpu.dot_dimension_numbers<[1], [0], [0], [1], [0, 0, 1, 1], [], []>} : vector<12x128xbf16>, vector<128x32xbf16>, vector<12x32xf32> -> vector<12x32xf32>
    %301 = arith.addf %259, %300 : vector<12x32xf32>
    %302 = vector.broadcast %178 : vector<1x32xf32> to vector<12x32xf32>
    %303 = arith.addf %301, %302 : vector<12x32xf32>
    %304 = vector.extract_strided_slice %303 {offsets = [0, 0], sizes = [4, 32], strides = [1, 1]} : vector<12x32xf32> to vector<4x32xf32>
    %cst_81 = arith.constant dense<0.000000e+00> : vector<4xf32>
    %305 = vector.multi_reduction <add>, %304, %cst_81 [1] : vector<4x32xf32> to vector<4xf32>
    %306 = vector.shape_cast %305 : vector<4xf32> to vector<4x1xf32>
    %cst_82 = arith.constant 3.200000e+01 : f32
    %307 = vector.broadcast %cst_82 : f32 to vector<4x1xf32>
    %308 = arith.divf %306, %307 : vector<4x1xf32>
    %309 = vector.broadcast %308 : vector<4x1xf32> to vector<4x32xf32>
    %310 = arith.subf %304, %309 : vector<4x32xf32>
    %311 = arith.mulf %310, %310 : vector<4x32xf32>
    %cst_83 = arith.constant dense<0.000000e+00> : vector<4xf32>
    %312 = vector.multi_reduction <add>, %311, %cst_83 [1] : vector<4x32xf32> to vector<4xf32>
    %313 = vector.shape_cast %312 : vector<4xf32> to vector<4x1xf32>
    %cst_84 = arith.constant 3.200000e+01 : f32
    %314 = vector.broadcast %cst_84 : f32 to vector<4x1xf32>
    %315 = arith.divf %313, %314 : vector<4x1xf32>
    %316 = vector.broadcast %308 : vector<4x1xf32> to vector<4x32xf32>
    %317 = arith.subf %304, %316 : vector<4x32xf32>
    %cst_85 = arith.constant 9.99999974E-6 : f32
    %318 = vector.broadcast %cst_85 : f32 to vector<4x1xf32>
    %319 = arith.addf %315, %318 : vector<4x1xf32>
    %320 = math.rsqrt %319 : vector<4x1xf32>
    %321 = vector.broadcast %320 : vector<4x1xf32> to vector<4x32xf32>
    %322 = arith.mulf %317, %321 : vector<4x32xf32>
    %323 = vector.broadcast %3 : vector<1x32xf32> to vector<4x32xf32>
    %324 = arith.mulf %322, %323 : vector<4x32xf32>
    %325 = vector.broadcast %4 : vector<1x32xf32> to vector<4x32xf32>
    %326 = arith.addf %324, %325 : vector<4x32xf32>
    %327 = vector.extract_strided_slice %326 {offsets = [0, 0], sizes = [2, 32], strides = [1, 1]} : vector<4x32xf32> to vector<2x32xf32>
    %cst_86 = arith.constant dense<0.000000e+00> : vector<2xf32>
    %328 = vector.multi_reduction <add>, %327, %cst_86 [1] : vector<2x32xf32> to vector<2xf32>
    %329 = vector.shape_cast %328 : vector<2xf32> to vector<2x1xf32>
    %cst_87 = arith.constant 3.200000e+01 : f32
    %330 = vector.broadcast %cst_87 : f32 to vector<2x1xf32>
    %331 = arith.divf %329, %330 : vector<2x1xf32>
    %332 = vector.broadcast %331 : vector<2x1xf32> to vector<2x32xf32>
    %333 = arith.subf %327, %332 : vector<2x32xf32>
    %334 = arith.mulf %333, %333 : vector<2x32xf32>
    %cst_88 = arith.constant dense<0.000000e+00> : vector<2xf32>
    %335 = vector.multi_reduction <add>, %334, %cst_88 [1] : vector<2x32xf32> to vector<2xf32>
    %336 = vector.shape_cast %335 : vector<2xf32> to vector<2x1xf32>
    %cst_89 = arith.constant 3.200000e+01 : f32
    %337 = vector.broadcast %cst_89 : f32 to vector<2x1xf32>
    %338 = arith.divf %336, %337 : vector<2x1xf32>
    %339 = vector.broadcast %331 : vector<2x1xf32> to vector<2x32xf32>
    %340 = arith.subf %327, %339 : vector<2x32xf32>
    %cst_90 = arith.constant 9.99999974E-6 : f32
    %341 = vector.broadcast %cst_90 : f32 to vector<2x1xf32>
    %342 = arith.addf %338, %341 : vector<2x1xf32>
    %343 = math.rsqrt %342 : vector<2x1xf32>
    %344 = vector.broadcast %343 : vector<2x1xf32> to vector<2x32xf32>
    %345 = arith.mulf %340, %344 : vector<2x32xf32>
    %346 = vector.broadcast %3 : vector<1x32xf32> to vector<2x32xf32>
    %347 = arith.mulf %345, %346 : vector<2x32xf32>
    %348 = vector.broadcast %4 : vector<1x32xf32> to vector<2x32xf32>
    %349 = arith.addf %347, %348 : vector<2x32xf32>
    %350 = vector.extract_strided_slice %326 {offsets = [2, 0], sizes = [2, 32], strides = [1, 1]} : vector<4x32xf32> to vector<2x32xf32>
    %351 = arith.truncf %349 : vector<2x32xf32> to vector<2x32xbf16>
    %c0_91 = arith.constant 0 : index
    %c0_92 = arith.constant 0 : index
    %352 = vector.load %arg8[%c0_91, %c0_92] : memref<32x32xbf16, #tpu.memory_space<vmem>>, vector<32x16xbf16>
    %cst_93 = arith.constant dense<0.000000e+00> : vector<2x16xf32>
    %353 = tpu.matmul %351, %352, %cst_93 {dimension_numbers = #tpu.dot_dimension_numbers<[1], [0], [0], [1], [0, 0, 1, 1], [], []>} : vector<2x32xbf16>, vector<32x16xbf16>, vector<2x16xf32> -> vector<2x16xf32>
    %354 = arith.truncf %350 : vector<2x32xf32> to vector<2x32xbf16>
    %c0_94 = arith.constant 0 : index
    %c16 = arith.constant 16 : index
    %355 = vector.load %arg8[%c0_94, %c16] : memref<32x32xbf16, #tpu.memory_space<vmem>>, vector<32x16xbf16>
    %cst_95 = arith.constant dense<0.000000e+00> : vector<2x16xf32>
    %356 = tpu.matmul %354, %355, %cst_95 {dimension_numbers = #tpu.dot_dimension_numbers<[1], [0], [0], [1], [0, 0, 1, 1], [], []>} : vector<2x32xbf16>, vector<32x16xbf16>, vector<2x16xf32> -> vector<2x16xf32>
    %357 = vector.broadcast %5 : vector<1x16xf32> to vector<2x16xf32>
    %358 = arith.addf %356, %357 : vector<2x16xf32>
    %359 = tpu.concatenate %353, %358 in 1 : vector<2x16xf32>, vector<2x16xf32> -> vector<2x32xf32>
    %c0_96 = arith.constant 0 : index
    %c0_97 = arith.constant 0 : index
    %360 = vector.load %arg9[%c0_96, %c0_97] : memref<2x32xf32, #tpu.memory_space<vmem>>, vector<2x32xf32>
    tpu.vector_store %arg9[%c0_96, %c0_97], %359 {strides = array<i32>} : memref<2x32xf32, #tpu.memory_space<vmem>>, vector<2x32xf32>,
    return
  }
  func.func @transform_0(%arg0: i32) -> (i32, i32) {
    %c0_i32 = arith.constant 0 : i32
    %c0_i32_0 = arith.constant 0 : i32
    %c0_i32_1 = arith.constant 0 : i32
    return %c0_i32, %c0_i32_0 : i32, i32
  }
  func.func @transform_1(%arg0: i32) -> (i32, i32) {
    %c0_i32 = arith.constant 0 : i32
    %c0_i32_0 = arith.constant 0 : i32
    %c0_i32_1 = arith.constant 0 : i32
    return %c0_i32, %c0_i32_0 : i32, i32
  }
  func.func @transform_2(%arg0: i32) -> (i32, i32) {
    %c0_i32 = arith.constant 0 : i32
    %c0_i32_0 = arith.constant 0 : i32
    %c0_i32_1 = arith.constant 0 : i32
    return %c0_i32, %c0_i32_0 : i32, i32
  }
  func.func @transform_3(%arg0: i32) -> (i32, i32) {
    %c0_i32 = arith.constant 0 : i32
    %c0_i32_0 = arith.constant 0 : i32
    %c0_i32_1 = arith.constant 0 : i32
    return %c0_i32, %c0_i32_0 : i32, i32
  }
  func.func @transform_4(%arg0: i32) -> (i32, i32) {
    %c0_i32 = arith.constant 0 : i32
    %c0_i32_0 = arith.constant 0 : i32
    %c0_i32_1 = arith.constant 0 : i32
    return %c0_i32, %c0_i32_0 : i32, i32
  }
  func.func @transform_5(%arg0: i32) -> (i32, i32, i32) {
    %c0_i32 = arith.constant 0 : i32
    %c0_i32_0 = arith.constant 0 : i32
    %c0_i32_1 = arith.constant 0 : i32
    %c0_i32_2 = arith.constant 0 : i32
    return %c0_i32, %c0_i32_0, %c0_i32_1 : i32, i32, i32
  }
  func.func @transform_6(%arg0: i32) -> (i32, i32, i32) {
    %c0_i32 = arith.constant 0 : i32
    %c0_i32_0 = arith.constant 0 : i32
    %c0_i32_1 = arith.constant 0 : i32
    %c0_i32_2 = arith.constant 0 : i32
    return %c0_i32, %c0_i32_0, %c0_i32_1 : i32, i32, i32
  }
  func.func @transform_7(%arg0: i32) -> (i32, i32) {
    %c0_i32 = arith.constant 0 : i32
    %c0_i32_0 = arith.constant 0 : i32
    %c0_i32_1 = arith.constant 0 : i32
    return %c0_i32, %c0_i32_0 : i32, i32
  }
  func.func @transform_8(%arg0: i32) -> (i32, i32) {
    %c0_i32 = arith.constant 0 : i32
    %c0_i32_0 = arith.constant 0 : i32
    %c0_i32_1 = arith.constant 0 : i32
    return %c0_i32, %c0_i32_0 : i32, i32
  }
}

</mosaic_0001>

<bundles_post_ra>
// kernel: tpu_custom_call.1
= control target key start
LH: loop header
LB: loop body
LE: loop exit
PB: predicated region body
PF: predicated region fallthrough
CT: control target
= control target key end

     0   :  { %v2151_v1 = vmov 0   ;;  %vm136_vm0 = vcmask 523264   ;;  %s2681_s0 = inlined_call_operand.vmem [shape: f32[8,192], index: 0, kind: input, shape index: {}]   ;;  %s2682_s1 = inlined_call_operand.vmem [shape: f32[12,32], index: 1, kind: input, shape index: {}]   ;;  %s2683_s2 = inlined_call_operand.vmem [shape: f32[12,12], index: 2, kind: input, shape index: {}]   ;;  %s2684_s3 = inlined_call_operand.vmem [shape: f32[21,128], index: 3, kind: input, shape index: {}]   ;;  %s2685_s4 = inlined_call_operand.vmem [shape: bf16[192,32], index: 4, kind: input, shape index: {}]   ;;  %s2686_s5 = inlined_call_operand.vmem [shape: bf16[2,32,256], index: 5, kind: input, shape index: {}]   ;;  %s2687_s6 = inlined_call_operand.vmem [shape: bf16[2,128,32], index: 6, kind: input, shape index: {}]   ;;  %s2688_s7 = inlined_call_operand.vmem [shape: bf16[32,32], index: 7, kind: input, shape index: {}]   ;;  %s2689_s8 = inlined_call_operand.hbm [shape: f32[2,32], index: 8, kind: output, shape index: {}]  }
   0x1   :  { %v2020_v0 = vld [vmem:[%s2685_s4] sm:$0xff]   ;;  %140 = vmatprep.subr.bf16.mxu0 %v2151_v1  ;;  %v2021_v2 = vld [vmem:[%s2685_s4 + $0x8] sm:$0xff]   ;;  %v2022_v3 = vld [vmem:[%s2685_s4 + $0x10] sm:$0xff]  }
   0x2   :  { %141 = vmatpush1.bf16.msra.mxu0 %v2020_v0  ;;  %v2023_v4 = vld [vmem:[%s2685_s4 + $0x18] sm:$0xff]   ;;  %v2024_v5 = vld [vmem:[%s2685_s4 + $0x20] sm:$0xff]   ;;  %v37_v6 = vld [vmem:[%s2681_s0 + $0x8] sm:$0xff] }
   0x3   :  { %142 = vmatprep.subr.bf16.mxu0 %v2151_v1  ;;  %v39_v7 = vpack.c.bf16 %v37_v6, %v37_v6  ;;  %v2025_v8 = vld [vmem:[%s2685_s4 + $0x28] sm:$0xff]   ;;  %v2026_v9 = vld [vmem:[%s2685_s4 + $0x30] sm:$0xff]   ;;  %v2027_v10 = vld [vmem:[%s2685_s4 + $0x38] sm:$0xff]  }
   0x5   :  { %1726 = vmatprep.mubr.msk.bf16.mxu0 %vm136_vm0, %v39_v7 }
   0x6   :  { %143 = vmatpush1.bf16.msra.mxu0 %v2021_v2 }
   0x7   :  { %144 = vmatprep.subr.bf16.mxu0 %v2151_v1 }
   0xa   :  { %145 = vmatpush1.bf16.msra.mxu0 %v2022_v3 }
   0xb   :  { %146 = vmatprep.subr.bf16.mxu0 %v2151_v1 }
   0xe   :  { %147 = vmatpush1.bf16.msra.mxu0 %v2023_v4 }
   0xf   :  { %148 = vmatprep.subr.bf16.mxu0 %v2151_v1 }
  0x12   :  { %149 = vmatpush1.bf16.msra.mxu0 %v2024_v5 }
  0x13   :  { %150 = vmatprep.subr.bf16.mxu0 %v2151_v1 }
  0x16   :  { %151 = vmatpush1.bf16.msra.mxu0 %v2025_v8 }
  0x17   :  { %152 = vmatprep.subr.bf16.mxu0 %v2151_v1 }
  0x1a   :  { %153 = vmatpush1.bf16.msra.mxu0 %v2026_v9 }
  0x1b   :  { %154 = vmatprep.subr.bf16.mxu0 %v2151_v1 }
  0x1c   :  { %13 = vsyncpa [#allocation3], 0  ;;  %v2028_v11 = vld [vmem:[%s2685_s4 + $0x40] sm:$0xff]   ;;  %v2029_v12 = vld [vmem:[%s2685_s4 + $0x48] sm:$0xff]   ;;  %vm187_vm1 = vcmask 1043456   ;;  %vm189_vm2 = vcmask 261120   ;;  %v218_v41 = vlaneseq }
  0x1d   :  { %v2030_v13 = vld [vmem:[%s2685_s4 + $0x50] sm:$0xff]   ;;  %v2031_v14 = vld [vmem:[%s2685_s4 + $0x58] sm:$0xff]   ;;  %v36_v15 = vld [vmem:[%s2681_s0] sm:$0xff]  ;;  %vm193_vm3 = vcmask 257024   ;;  %v2152_v9 = vmov 0.0   ;;  %vm2153_vm4 = vmmov 0  }
  0x1e   :  { %155 = vmatpush1.bf16.msra.mxu0 %v2027_v10  ;;  %v38_v16 = vpack.c.bf16 %v36_v15, %v36_v15  ;;  %v180_v18 = vld [vmem:[%s2682_s1] sm:$0xff]  ;;  %v181_v24 = vld [vmem:[%s2682_s1 + $0x8] sm:$0xf]  ;;  %v2259_v45 = vshrl.u32 %v218_v41, 7  ;;  %1847 = vmatprep.subr.bf16.mxu1 %v2152_v9  ;;  %v2299_v10 = vld [vmem:[%s2686_s5 + $0x10] ss:$8 sps:$4 sm:$0xff]  }
  0x1f   :  { %156 = vmatprep.subr.bf16.mxu0 %v2151_v1  ;;  %v2267_v48 = vld [vmem:[%s2684_s3] sm:$0xff]  ;;  %1851 = vmatprep.mubr.msk.bf16.mxu1 %vm2153_vm4, %v2152_v9  ;;  %s2154_s18 = smov 96   ;;  %s2155_s19 = smov 80   ;;  %vm353_vm5 = vcmask 130048   ;;  %vm405_vm6 = vcmask 97280   ;;  %vm409_vm7 = vcmask 93184  }
  0x20   :  { %v2262_v47 = vsub.s32 0, %v2259_v45  ;;  %v2270_v49 = vsub.s32 1, %v2259_v45  ;;  %v2291_v8 = vld [vmem:[%s2686_s5] ss:$8 sps:$4 sm:$0xff]   ;;  %s2156_s20 = smov 112   ;;  %vm435_vm8 = vcmask 1045504  }
  0x21   :  { %1848 = vmatpush3.bf16.msra.mxu1 %v2291_v8  ;;  %s2158_s25 = smov 48   ;;  %s2159_s26 = smov 32   ;;  %vm1562_vm9 = vcmask 254976  }
  0x22   :  { %157 = vmatpush1.bf16.msra.mxu0 %v2028_v11  ;;  %v221_v50 = vrot.slane %v2267_v48, %v2262_v47  ;;  %v227_v53 = vrot.slane %v2267_v48, %v2270_v49  ;;  %1849 = vmatprep.subr.bf16.mxu1 %v2152_v9  ;;  %s2160_s27 = smov 16  }
  0x23   :  { %158 = vmatprep.subr.bf16.mxu0 %v2151_v1 }
  0x25   :  { %1850 = vmatpush3.bf16.msra.mxu1 %v2299_v10 }
  0x26   :  { %159 = vmatpush1.bf16.msra.mxu0 %v2029_v12  ;;  %1855 = vmatprep.subr.bf16.mxu1 %v2152_v9 }
  0x27   :  { %160 = vmatprep.subr.bf16.mxu0 %v2151_v1 }
  0x2a   :  { %161 = vmatpush1.bf16.msra.mxu0 %v2030_v13 }
  0x2b   :  { %162 = vmatprep.subr.bf16.mxu0 %v2151_v1 }
  0x2e   :  { %163 = vmatpush1.bf16.msra.mxu0 %v2031_v14 }
  0x2f   :  { %1915 = vmatprep.subr.bf16.mxu0 %v2152_v9 }
  0x31   :  { %173 = vmatmul.mubr.bf16.vlgmr.msra.gmra.mrb[0].mxu0 %v38_v16 }
  0x32   :  { %1919 = vmatprep.mubr.msk.bf16.mxu0 %vm2153_vm4, %v2152_v9 }
 0x104   :  { %v174_v17 = vpop.f32.mrb[0].mxu0 }
 0x105   :  { %v183_v19 = vrot.slane %v174_v17, 4  ;;  %v176_v20 = vpop.f32.mrb[1].mxu0  ;;  %v278_v17 = vsub.s32 5, %v2259_v45 }
 0x106   :  { %v177_v21 = vpop.f32.mrb[2].mxu0 }
 0x107   :  { %v185_v22 = vadd.f32 %v183_v19, %v180_v18  ;;  %v178_v23 = vpop.f32.mrb[3].mxu0  ;;  %v186_v27 = vadd.f32 %v183_v19, %v181_v24  ;;  %v279_v20 = vrot.slane %v2267_v48, %v278_v17  ;;  %v284_v21 = vsub.s32 6, %v2259_v45 }
 0x109   :  { %v188_v25 = vsel %vm187_vm1, %v180_v18, %v185_v22  ;;  %v194_v28 = vsel %vm193_vm3, %v186_v27, 0.0 }
 0x10a   :  { %v190_v26 = vsel %vm189_vm2, %v188_v25, 0.0 }
 0x10b   :  { %191 = vadd.xlane.f32.xlu0 %v190_v26 }
 0x10f   :  { %195 = vadd.xlane.f32.xlu0 %v194_v28 }
 0x198   :  { %v192_v29 = vpop.xlane.xlu0 %191 }
 0x199   :  { %v198_v30 = vmul.f32 0.03125, %v192_v29 }
 0x19b   :  { %v200_v31 = vsub.f32 %v188_v25, %v198_v30  ;;  %v285_v25 = vrot.slane %v2267_v48, %v284_v21  ;;  %v291_v30 = vsub.s32 7, %v2259_v45 }
 0x19c   :  { %v196_v32 = vpop.xlane.xlu0 %195 }
 0x19d   :  { %v199_v33 = vmul.f32 0.03125, %v196_v32  ;;  %v202_v34 = vmul.f32 %v200_v31, %v200_v31 }
 0x19f   :  { %v201_v35 = vsub.f32 %v186_v27, %v199_v33  ;;  %v204_v36 = vsel %vm189_vm2, %v202_v34, 0.0 }
 0x1a0   :  { %205 = vadd.xlane.f32.xlu1 %v204_v36 }
 0x1a1   :  { %v203_v37 = vmul.f32 %v201_v35, %v201_v35 }
 0x1a3   :  { %v207_v38 = vsel %vm193_vm3, %v203_v37, 0.0 }
 0x1a4   :  { %208 = vadd.xlane.f32.xlu1 %v207_v38 }
 0x22d   :  { %v206_v39 = vpop.xlane.xlu1 %205 }
 0x22e   :  { %v210_v40 = vmul.f32 0.03125, %v206_v39 }
 0x230   :  { %v212_v42 = vadd.f32 1e-05, %v210_v40 }
 0x231   :  { %v209_v43 = vpop.xlane.xlu1 %208 }
 0x232   :  { %2062 = vrsqrt.f32 %v212_v42  ;;  %v211_v44 = vmul.f32 0.03125, %v209_v43  ;;  %v2340_v42 = vld [vmem:[%s2683_s2] sm:$0xff] }
 0x234   :  { %v213_v46 = vadd.f32 1e-05, %v211_v44 }
 0x236   :  { %2064 = vrsqrt.f32 %v213_v46 }
 0x23c   :  { %v2063_v51 = vpop.eup %2062 }
 0x23d   :  { %v216_v52 = vmul.f32 %v2063_v51, %v200_v31  ;;  %v292_v31 = vrot.slane %v2267_v48, %v291_v30  ;;  %v2345_v48 = vld [vmem:[%s2683_s2 + $0x8] sm:$0xf]  ;;  %s2157_s2 = smov 64  }
 0x23f   :  { %v222_v54 = vmul.f32 %v221_v50, %v216_v52 }
 0x240   :  { %v2065_v55 = vpop.eup %2064 }
 0x241   :  { %v2276_v56 = vadd.f32 %v227_v53, %v222_v54  ;;  %v217_v57 = vmul.f32 %v2065_v55, %v201_v35 }
 0x243   :  { %v250_v58 = vsel %vm189_vm2, %v2276_v56, 0.0  ;;  %v223_v59 = vmul.f32 %v221_v50, %v217_v57 }
 0x244   :  { %251 = vadd.xlane.f32.xlu0 %v250_v58 }
 0x245   :  { %v2280_v60 = vadd.f32 %v227_v53, %v223_v59 }
 0x247   :  { %v253_v61 = vsel %vm193_vm3, %v2280_v60, 0.0 }
 0x248   :  { %254 = vadd.xlane.f32.xlu1 %v253_v61 }
 0x2d1   :  { %v252_v62 = vpop.xlane.xlu0 %251 }
 0x2d2   :  { %v256_v63 = vmul.f32 0.03125, %v252_v62 }
 0x2d4   :  { %v258_v0 = vsub.f32 %v2276_v56, %v256_v63 }
 0x2d5   :  { %v255_v1 = vpop.xlane.xlu1 %254 }
 0x2d6   :  { %v257_v2 = vmul.f32 0.03125, %v255_v1  ;;  %v260_v3 = vmul.f32 %v258_v0, %v258_v0 }
 0x2d8   :  { %v259_v4 = vsub.f32 %v2280_v60, %v257_v2  ;;  %v262_v5 = vsel %vm189_vm2, %v260_v3, 0.0 }
 0x2d9   :  { %263 = vadd.xlane.f32.xlu0 %v262_v5 }
 0x2da   :  { %v261_v6 = vmul.f32 %v259_v4, %v259_v4 }
 0x2dc   :  { %v265_v7 = vsel %vm193_vm3, %v261_v6, 0.0 }
 0x2dd   :  { %266 = vadd.xlane.f32.xlu1 %v265_v7 }
 0x366   :  { %v264_v11 = vpop.xlane.xlu0 %263 }
 0x367   :  { %v268_v12 = vmul.f32 0.03125, %v264_v11 }
 0x369   :  { %v270_v13 = vadd.f32 1e-05, %v268_v12 }
 0x36a   :  { %v267_v14 = vpop.xlane.xlu1 %266 }
 0x36b   :  { %2066 = vrsqrt.f32 %v270_v13  ;;  %v269_v15 = vmul.f32 0.03125, %v267_v14 }
 0x36d   :  { %v271_v16 = vadd.f32 1e-05, %v269_v15 }
 0x36f   :  { %2068 = vrsqrt.f32 %v271_v16 }
 0x375   :  { %v2067_v18 = vpop.eup %2066 }
 0x376   :  { %v274_v19 = vmul.f32 %v2067_v18, %v258_v0 }
 0x378   :  { %v280_v24 = vmul.f32 %v279_v20, %v274_v19 }
 0x379   :  { %v2069_v22 = vpop.eup %2068 }
 0x37a   :  { %v275_v23 = vmul.f32 %v2069_v22, %v259_v4  ;;  %v286_v27 = vadd.f32 %v285_v25, %v280_v24 }
 0x37c   :  { %v281_v26 = vmul.f32 %v279_v20, %v275_v23 }
 0x37e   :  { %v287_v28 = vadd.f32 %v285_v25, %v281_v26 }
 0x380   :  { %v288_v29 = vpack.c.bf16 %v287_v28, %v286_v27 }
 0x382   :  { %1852 = vmatmul.mubr.msk.bf16.vlgmr.msra.gmra.mrb[0].mxu1 %vm189_vm2, %v288_v29 }
 0x383   :  { %1857 = vmatprep.mubr.msk.bf16.mxu1 %vm2153_vm4, %v2152_v9 }
 0x455   :  { %v342_v32 = vpop.f32.mrb[0].mxu1 }
 0x456   :  { %v1853_v33 = vpop.f32.mrb[1].mxu1  ;;  %v343_v35 = vadd.f32 %v342_v32, %v292_v31 }
 0x457   :  { %v345_v34 = vpop.f32.mrb[2].mxu1 }
 0x458   :  { %v346_v36 = vadd.f32 %v345_v34, %v292_v31  ;;  %v1854_v37 = vpop.f32.mrb[3].mxu1 }
 0x45a   :  { %v2323_v38 = vpack.c.bf16 %v346_v36, %v343_v35 }
 0x45c   :  { %351 = vrot.lane.b32.xlu0 %v2323_v38, %s2154_s18 }
 0x460   :  { %482 = vrot.lane.b32.xlu0 %v2323_v38, %s2155_s19 }
 0x464   :  { %480 = vrot.lane.b32.xlu0 %v2323_v38, %s2156_s20 }
 0x4ce   :  { %v352_v39 = vpop.permute.xlu0 %351 }
 0x4cf   :  { %v358_v40 = vsel %vm353_vm5, %v352_v39, 0 }
 0x4d0   :  { %1856 = vmatpush3.bf16.xpose.msra.mxu1 %v358_v40 }
 0x4d1   :  { %1861 = vmatprep.subr.bf16.mxu1 %v2152_v9 }
 0x4d2   :  { %v483_v15 = vpop.permute.xlu0 %482 }
 0x4d3   :  { %v488_v18 = vsel %vm353_vm5, %v483_v15, 0 }
 0x4d6   :  { %v481_v19 = vpop.permute.xlu0 %480 }
 0x4d7   :  { %1858 = vmatmul.mubr.msk.bf16.vlgmr.msra.gmra.mrb[4].mxu1 %vm353_vm5, %v2323_v38 }
 0x4d8   :  { %1863 = vmatprep.mubr.msk.bf16.mxu1 %vm2153_vm4, %v2152_v9 }
 0x5aa   :  { %v394_v41 = vpop.f32.mrb[4].mxu1 }
 0x5ab   :  { %v401_v43 = vmul.f32 0.25, %v394_v41  ;;  %v1859_v44 = vpop.f32.mrb[5].mxu1 }
 0x5ac   :  { %v397_v46 = vpop.f32.mrb[6].mxu1 }
 0x5ad   :  { %v402_v50 = vmul.f32 0.25, %v397_v46  ;;  %v1860_v51 = vpop.f32.mrb[7].mxu1  ;;  %v403_v52 = vadd.f32 %v401_v43, %v2340_v42 }
 0x5af   :  { %v406_v53 = vsel %vm405_vm6, %v403_v52, -inf  ;;  %v404_v54 = vadd.f32 %v402_v50, %v2345_v48 }
 0x5b0   :  { %407 = vmax.xlane.f32.xlu1 %v406_v53 }
 0x5b1   :  { %v410_v55 = vsel %vm409_vm7, %v404_v54, -inf }
 0x5b4   :  { %411 = vmax.xlane.f32.xlu1 %v410_v55 }
 0x63d   :  { %v408_v57 = vpop.xlane.xlu1 %407 }
 0x63e   :  { %v413_v58 = vsub.f32 %v403_v52, %v408_v57 }
 0x640   :  { %v415_v59 = vmul.f32 1.442695, %v413_v58 }
 0x641   :  { %v412_v61 = vpop.xlane.xlu1 %411 }
 0x642   :  { %2070 = vpow2.f32 %v415_v59  ;;  %v414_v62 = vsub.f32 %v404_v54, %v412_v61 }
 0x644   :  { %v417_v63 = vmul.f32 1.442695, %v414_v62 }
 0x646   :  { %2072 = vpow2.f32 %v417_v63 }
 0x64c   :  { %v2071_v0 = vpop.eup %2070 }
 0x64d   :  { %v419_v1 = vsel %vm405_vm6, %v2071_v0, 0.0 }
 0x64e   :  { %420 = vadd.xlane.f32.xlu1 %v419_v1 }
 0x650   :  { %v2073_v2 = vpop.eup %2072 }
 0x651   :  { %v422_v3 = vsel %vm409_vm7, %v2073_v2, 0.0 }
 0x652   :  { %423 = vadd.xlane.f32.xlu1 %v422_v3 }
 0x663   :  { %430 = vrot.lane.b32.xlu1 %v2323_v38, %s2157_s2 }
 0x6db   :  { %v421_v4 = vpop.xlane.xlu1 %420 }
 0x6dc   :  { %2074 = vrcp.f32 %v421_v4 }
 0x6df   :  { %v424_v5 = vpop.xlane.xlu1 %423 }
 0x6e0   :  { %2076 = vrcp.f32 %v424_v5 }
 0x6e3   :  { %v431_v6 = vpop.permute.xlu1 %430 }
 0x6e4   :  { %v437_v7 = vsel %vm435_vm8, %v431_v6, 0 }
 0x6e5   :  { %1862 = vmatpush3.bf16.msra.mxu1 %v437_v7 }
 0x6e6   :  { %1867 = vmatprep.subr.bf16.mxu1 %v2152_v9  ;;  %v2075_v11 = vpop.eup %2074 }
 0x6e7   :  { %v426_v13 = vmul.f32 %v2075_v11, %v2071_v0 }
 0x6ea   :  { %v2077_v12 = vpop.eup %2076 }
 0x6eb   :  { %v428_v14 = vmul.f32 %v2077_v12, %v2073_v2 }
 0x6ed   :  { %v429_v16 = vpack.c.bf16 %v428_v14, %v426_v13  ;;  %v2034_v13 = vld [vmem:[%s2686_s5 + $0x4] ss:$8 sps:$4 sm:$0xff]  }
 0x6ee   :  { %v2404_v14 = vld [vmem:[%s2684_s3 + $0x8] sm:$0xff] }
 0x6ef   :  { %1864 = vmatmul.mubr.msk.bf16.vlgmr.msra.gmra.mrb[8].mxu1 %vm405_vm6, %v429_v16  ;;  %v673_v15 = vrot.slane %v2404_v14, %v2262_v47 }
 0x6f0   :  { %1868 = vmatpush3.bf16.xpose.msra.mxu1 %v488_v18  ;;  %1869 = vmatprep.mubr.msk.bf16.mxu1 %vm2153_vm4, %v2152_v9 }
 0x6f1   :  { %1873 = vmatprep.subr.bf16.mxu1 %v2152_v9 }
 0x6f7   :  { %1870 = vmatmul.mubr.msk.bf16.vlgmr.msra.gmra.mrb[12].mxu1 %vm353_vm5, %v481_v19 }
 0x6f8   :  { %1875 = vmatprep.mubr.msk.bf16.mxu1 %vm2153_vm4, %v2152_v9 }
 0x7c2   :  { %v2365_v20 = vpop.f32.mrb[8].mxu1 }
 0x7c3   :  { %v1865_v22 = vpop.f32.mrb[9].mxu1 }
 0x7c4   :  { %v476_v23 = vpop.f32.mrb[10].mxu1 }
 0x7c5   :  { %v1866_v24 = vpop.f32.mrb[11].mxu1 }
 0x7ca   :  { %v524_v25 = vpop.f32.mrb[12].mxu1 }
 0x7cb   :  { %v531_v26 = vmul.f32 0.25, %v524_v25  ;;  %v1871_v27 = vpop.f32.mrb[13].mxu1 }
 0x7cc   :  { %v527_v28 = vpop.f32.mrb[14].mxu1 }
 0x7cd   :  { %v532_v29 = vmul.f32 0.25, %v527_v28  ;;  %v1872_v31 = vpop.f32.mrb[15].mxu1  ;;  %v533_v32 = vadd.f32 %v531_v26, %v2340_v42 }
 0x7cf   :  { %v535_v33 = vsel %vm405_vm6, %v533_v32, -inf  ;;  %v534_v34 = vadd.f32 %v532_v29, %v2345_v48 }
 0x7d0   :  { %536 = vmax.xlane.f32.xlu0 %v535_v33 }
 0x7d1   :  { %v538_v35 = vsel %vm409_vm7, %v534_v34, -inf }
 0x7d2   :  { %539 = vmax.xlane.f32.xlu1 %v538_v35 }
 0x7e3   :  { %618 = vrot.lane.b32.xlu1 %v2291_v8, %s2159_s26 }
 0x85d   :  { %v537_v36 = vpop.xlane.xlu0 %536 }
 0x85e   :  { %v541_v37 = vsub.f32 %v533_v32, %v537_v36 }
 0x85f   :  { %v540_v39 = vpop.xlane.xlu1 %539 }
 0x860   :  { %v543_v40 = vmul.f32 1.442695, %v541_v37  ;;  %v542_v41 = vsub.f32 %v534_v34, %v540_v39 }
 0x862   :  { %2078 = vpow2.f32 %v543_v40  ;;  %v545_v43 = vmul.f32 1.442695, %v542_v41 }
 0x864   :  { %2080 = vpow2.f32 %v545_v43 }
 0x86c   :  { %v2079_v44 = vpop.eup %2078 }
 0x86d   :  { %v547_v46 = vsel %vm405_vm6, %v2079_v44, 0.0 }
 0x86e   :  { %v2081_v50 = vpop.eup %2080  ;;  %548 = vadd.xlane.f32.xlu0 %v547_v46 }
 0x86f   :  { %v550_v51 = vsel %vm409_vm7, %v2081_v50, 0.0 }
 0x872   :  { %551 = vadd.xlane.f32.xlu0 %v550_v51 }
 0x888   :  { %558 = vrot.lane.b32.xlu0 %v2323_v38, %s2158_s25  ;;  %v619_v38 = vpop.permute.xlu1 %618 }
 0x8fb   :  { %v549_v52 = vpop.xlane.xlu0 %548 }
 0x8fc   :  { %2082 = vrcp.f32 %v549_v52  ;;  %v2425_v52 = vsub.s32 2, %v2259_v45 }
 0x8ff   :  { %v552_v53 = vpop.xlane.xlu0 %551 }
 0x900   :  { %2084 = vrcp.f32 %v552_v53 }
 0x903   :  { %v559_v54 = vpop.permute.xlu0 %558 }
 0x904   :  { %v564_v55 = vsel %vm435_vm8, %v559_v54, 0 }
 0x905   :  { %1874 = vmatpush3.bf16.msra.mxu1 %v564_v55 }
 0x906   :  { %1879 = vmatprep.subr.bf16.mxu1 %v2152_v9  ;;  %v2083_v57 = vpop.eup %2082 }
 0x907   :  { %v554_v59 = vmul.f32 %v2083_v57, %v2079_v44  ;;  %v711_v57 = vrot.slane %v2404_v14, %v2425_v52 }
 0x90a   :  { %v2085_v58 = vpop.eup %2084 }
 0x90b   :  { %v556_v61 = vmul.f32 %v2085_v58, %v2081_v50  ;;  %v705_v50 = vrot.slane %v2404_v14, %v2270_v49 }
 0x90d   :  { %v557_v62 = vpack.c.bf16 %v556_v61, %v554_v59 }
 0x90f   :  { %1876 = vmatmul.mubr.msk.bf16.vlgmr.msra.gmra.mrb[16].mxu1 %vm405_vm6, %v557_v62 }
 0x910   :  { %1883 = vmatprep.mubr.msk.bf16.mxu1 %vm2153_vm4, %v2152_v9  ;;  %1880 = vmatpush3.bf16.msra.mxu1 %v619_v38  ;;  %v2038_v38 = vld [vmem:[%s2687_s6] sm:$0xff]  }
 0x911   :  { %1881 = vmatprep.subr.bf16.mxu1 %v2152_v9 }
 0x9e2   :  { %v600_v63 = vpop.f32.mrb[16].mxu1 }
 0x9e3   :  { %v1877_v0 = vpop.f32.mrb[17].mxu1 }
 0x9e4   :  { %v603_v1 = vpop.f32.mrb[18].mxu1  ;;  %v2040_v0 = vld [vmem:[%s2687_s6 + $0x10] sm:$0xff]  }
 0x9e5   :  { %v2010_v2 = vpack.i.bf16 %v603_v1, %v600_v63  ;;  %v1878_v3 = vpop.f32.mrb[19].mxu1  ;;  %v2039_v63 = vld [vmem:[%s2687_s6 + $0x8] sm:$0xff]   ;;  %v2041_v1 = vld [vmem:[%s2687_s6 + $0x18] sm:$0xff]  }
 0x9e6   :  { %v2043_v3 = vld [vmem:[%s2687_s6 + $0x28] sm:$0xff]  }
 0x9e7   :  { %2011 = vrot.lane.b32.xlu1 %v2010_v2, %s2160_s27  ;;  %v2042_v2 = vld [vmem:[%s2687_s6 + $0x20] sm:$0xff]  }
 0x9eb   :  { %620 = vrot.lane.b32.xlu1 %v2299_v10, %s2159_s26  ;;  %v2037_v10 = vld [vmem:[%s2686_s5 + $0x14] ss:$8 sps:$4 sm:$0xff]  }
 0xa59   :  { %v2012_v4 = vpop.permute.xlu1 %2011 }
 0xa5a   :  { %v2014_v5 = vunpack.i.h.bf16 %v2012_v4  ;;  %v2013_v6 = vunpack.i.l.bf16 %v2012_v4  ;;  %v2044_v4 = vld [vmem:[%s2687_s6 + $0x30] sm:$0xff]  }
 0xa5c   :  { %v616_v8 = vsel %vm353_vm5, %v476_v23, %v2014_v5  ;;  %v615_v7 = vsel %vm353_vm5, %v2365_v20, %v2013_v6  ;;  %v2045_v5 = vld [vmem:[%s2687_s6 + $0x38] sm:$0xff]   ;;  %v2465_v6 = vsub.s32 3, %v2259_v45 }
 0xa5d   :  { %v617_v11 = vpack.c.bf16 %v616_v8, %v615_v7  ;;  %v621_v12 = vpop.permute.xlu1 %620 }
 0xa5e   :  { %1882 = vmatpush3.bf16.msra.mxu1 %v621_v12  ;;  %v718_v8 = vrot.slane %v2404_v14, %v2465_v6 }
 0xa5f   :  { %1887 = vmatprep.subr.bf16.mxu1 %v2152_v9 }
 0xa61   :  { %1884 = vmatmul.mubr.msk.bf16.vlgmr.msra.gmra.mrb[20].mxu1 %vm189_vm2, %v617_v11 }
 0xa62   :  { %1888 = vmatpush3.bf16.msra.mxu1 %v2034_v13  ;;  %1891 = vmatprep.mubr.msk.bf16.mxu1 %vm2153_vm4, %v2152_v9 }
 0xa63   :  { %1889 = vmatprep.subr.bf16.mxu1 %v2152_v9 }
 0xa66   :  { %1890 = vmatpush3.bf16.msra.mxu1 %v2037_v10 }
 0xa67   :  { %1895 = vmatprep.subr.bf16.mxu1 %v2152_v9 }
 0xb34   :  { %v661_v16 = vpop.f32.mrb[20].mxu1 }
 0xb35   :  { %v668_v18 = vadd.f32 %v661_v16, %v2276_v56  ;;  %v1885_v19 = vpop.f32.mrb[21].mxu1 }
 0xb36   :  { %v664_v20 = vpop.f32.mrb[22].mxu1 }
 0xb37   :  { %v2409_v22 = vadd.f32 %v673_v15, %v668_v18  ;;  %v669_v23 = vadd.f32 %v664_v20, %v2280_v60  ;;  %v1886_v24 = vpop.f32.mrb[23].mxu1 }
 0xb39   :  { %v2412_v25 = vadd.f32 %v673_v15, %v669_v23  ;;  %v676_v26 = vsel %vm189_vm2, %v2409_v22, 0.0 }
 0xb3a   :  { %677 = vadd.xlane.f32.xlu0 %v676_v26 }
 0xb3b   :  { %v679_v27 = vsel %vm193_vm3, %v2412_v25, 0.0 }
 0xb3c   :  { %680 = vadd.xlane.f32.xlu1 %v679_v27 }
 0xbc7   :  { %v678_v28 = vpop.xlane.xlu0 %677 }
 0xbc8   :  { %v682_v29 = vmul.f32 0.03125, %v678_v28 }
 0xbc9   :  { %v681_v56 = vpop.xlane.xlu1 %680 }
 0xbca   :  { %v684_v31 = vsub.f32 %v2409_v22, %v682_v29  ;;  %v683_v32 = vmul.f32 0.03125, %v681_v56 }
 0xbcc   :  { %v685_v33 = vsub.f32 %v2412_v25, %v683_v32  ;;  %v686_v60 = vmul.f32 %v684_v31, %v684_v31 }
 0xbce   :  { %v688_v34 = vsel %vm189_vm2, %v686_v60, 0.0  ;;  %v687_v35 = vmul.f32 %v685_v33, %v685_v33 }
 0xbcf   :  { %689 = vadd.xlane.f32.xlu0 %v688_v34 }
 0xbd0   :  { %v691_v36 = vsel %vm193_vm3, %v687_v35, 0.0 }
 0xbd3   :  { %692 = vadd.xlane.f32.xlu0 %v691_v36 }
 0xc5c   :  { %v690_v37 = vpop.xlane.xlu0 %689 }
 0xc5d   :  { %v694_v39 = vmul.f32 0.03125, %v690_v37 }
 0xc5f   :  { %v696_v40 = vadd.f32 1e-05, %v694_v39  ;;  %v2472_v39 = vsub.s32 4, %v2259_v45 }
 0xc60   :  { %v693_v41 = vpop.xlane.xlu0 %692 }
 0xc61   :  { %2086 = vrsqrt.f32 %v696_v40  ;;  %v695_v43 = vmul.f32 0.03125, %v693_v41  ;;  %v884_v40 = vrot.slane %v2404_v14, %v2472_v39 }
 0xc63   :  { %v697_v44 = vadd.f32 1e-05, %v695_v43 }
 0xc65   :  { %2088 = vrsqrt.f32 %v697_v44 }
 0xc6b   :  { %v2087_v46 = vpop.eup %2086 }
 0xc6c   :  { %v700_v51 = vmul.f32 %v2087_v46, %v684_v31 }
 0xc6e   :  { %v706_v54 = vmul.f32 %v705_v50, %v700_v51 }
 0xc6f   :  { %v2089_v53 = vpop.eup %2088 }
 0xc70   :  { %v701_v55 = vmul.f32 %v2089_v53, %v685_v33  ;;  %v712_v59 = vadd.f32 %v711_v57, %v706_v54 }
 0xc72   :  { %v707_v58 = vmul.f32 %v705_v50, %v701_v55 }
 0xc74   :  { %v713_v61 = vadd.f32 %v711_v57, %v707_v58 }
 0xc76   :  { %v714_v62 = vpack.c.bf16 %v713_v61, %v712_v59 }
 0xc78   :  { %1892 = vmatmul.mubr.msk.bf16.vlgmr.msra.gmra.mrb[24].mxu1 %vm189_vm2, %v714_v62 }
 0xc79   :  { %1911 = vmatprep.mubr.msk.bf16.mxu1 %vm2153_vm4, %v2152_v9  ;;  %1896 = vmatpush3.bf16.msra.mxu1 %v2038_v38 }
 0xc7a   :  { %1897 = vmatprep.subr.bf16.mxu1 %v2152_v9 }
 0xc7d   :  { %1898 = vmatpush3.bf16.msra.mxu1 %v2039_v63 }
 0xc7e   :  { %1899 = vmatprep.subr.bf16.mxu1 %v2152_v9 }
 0xc81   :  { %1900 = vmatpush3.bf16.msra.mxu1 %v2040_v0 }
 0xc82   :  { %1901 = vmatprep.subr.bf16.mxu1 %v2152_v9 }
 0xc85   :  { %1902 = vmatpush3.bf16.msra.mxu1 %v2041_v1 }
 0xc86   :  { %1903 = vmatprep.subr.bf16.mxu1 %v2152_v9 }
 0xc89   :  { %1904 = vmatpush3.bf16.msra.mxu1 %v2042_v2  ;;  %v2493_v2 = vld [vmem:[%s2686_s5 + $0x20] ss:$8 sps:$4 sm:$0xff]  }
 0xc8a   :  { %1905 = vmatprep.subr.bf16.mxu1 %v2152_v9  ;;  %1916 = vmatpush3.bf16.msra.mxu0 %v2493_v2 }
 0xc8b   :  { %1917 = vmatprep.subr.bf16.mxu0 %v2152_v9 }
 0xc8d   :  { %1906 = vmatpush3.bf16.msra.mxu1 %v2043_v3  ;;  %v2499_v3 = vld [vmem:[%s2686_s5 + $0x30] ss:$8 sps:$4 sm:$0xff]  }
 0xc8e   :  { %1907 = vmatprep.subr.bf16.mxu1 %v2152_v9  ;;  %1918 = vmatpush3.bf16.msra.mxu0 %v2499_v3 }
 0xc8f   :  { %1923 = vmatprep.subr.bf16.mxu0 %v2152_v9 }
 0xc91   :  { %1908 = vmatpush3.bf16.msra.mxu1 %v2044_v4 }
 0xc92   :  { %1909 = vmatprep.subr.bf16.mxu1 %v2152_v9 }
 0xc95   :  { %1910 = vmatpush3.bf16.msra.mxu1 %v2045_v5 }
 0xc96   :  { %1941 = vmatprep.subr.bf16.mxu1 %v2152_v9 }
 0xd4b   :  { %v764_v7 = vpop.f32.mrb[24].mxu1 }
 0xd4c   :  { %v765_v11 = vadd.f32 %v764_v7, %v718_v8  ;;  %v1893_v12 = vpop.f32.mrb[25].mxu1 }
 0xd4d   :  { %v767_v13 = vpop.f32.mrb[26].mxu1 }
 0xd4e   :  { %v773_v10 = vmul.f32 0.044715, %v765_v11  ;;  %v768_v15 = vadd.f32 %v767_v13, %v718_v8  ;;  %v1894_v16 = vpop.f32.mrb[27].mxu1  ;;  %v771_v33 = vmul.f32 0.5, %v765_v11  ;;  %v938_v13 = vrot.slane %v2404_v14, %v278_v17 }
 0xd4f   :  { %v951_v17 = vrot.slane %v2404_v14, %v291_v30 }
 0xd50   :  { %v775_v18 = vmul.f32 %v773_v10, %v765_v11  ;;  %v774_v19 = vmul.f32 0.044715, %v768_v15  ;;  %v772_v60 = vmul.f32 0.5, %v768_v15 }
 0xd52   :  { %v777_v20 = vmul.f32 %v775_v18, %v765_v11  ;;  %v776_v23 = vmul.f32 %v774_v19, %v768_v15  ;;  %v944_v18 = vrot.slane %v2404_v14, %v284_v21 }
 0xd54   :  { %v779_v24 = vadd.f32 %v777_v20, %v765_v11  ;;  %v778_v26 = vmul.f32 %v776_v23, %v768_v15 }
 0xd56   :  { %v781_v27 = vmul.f32 0.7978846, %v779_v24  ;;  %v780_v28 = vadd.f32 %v778_v26, %v768_v15 }
 0xd58   :  { %2090 = vtanh.f32 %v781_v27  ;;  %v782_v29 = vmul.f32 0.7978846, %v780_v28 }
 0xd5a   :  { %2092 = vtanh.f32 %v782_v29 }
 0xd62   :  { %v2091_v56 = vpop.eup %2090 }
 0xd63   :  { %v785_v31 = vadd.f32 1.0, %v2091_v56 }
 0xd64   :  { %v2093_v32 = vpop.eup %2092 }
 0xd65   :  { %v786_v34 = vadd.f32 1.0, %v2093_v32  ;;  %v787_v35 = vmul.f32 %v785_v31, %v771_v33 }
 0xd67   :  { %v788_v36 = vmul.f32 %v786_v34, %v772_v60 }
 0xd69   :  { %v789_v37 = vpack.c.bf16 %v788_v36, %v787_v35 }
 0xd6b   :  { %1912 = vmatmul.mubr.bf16.vlgmr.msra.gmra.mrb[28].mxu1 %v789_v37 }
 0xd6c   :  { %1943 = vmatprep.mubr.msk.bf16.mxu1 %vm2153_vm4, %v2152_v9 }
 0xe3e   :  { %v872_v41 = vpop.f32.mrb[28].mxu1 }
 0xe3f   :  { %v879_v43 = vadd.f32 %v872_v41, %v2409_v22  ;;  %v1913_v44 = vpop.f32.mrb[29].mxu1 }
 0xe40   :  { %v875_v46 = vpop.f32.mrb[30].mxu1 }
 0xe41   :  { %v2477_v50 = vadd.f32 %v884_v40, %v879_v43  ;;  %v880_v51 = vadd.f32 %v875_v46, %v2412_v25  ;;  %v1914_v53 = vpop.f32.mrb[31].mxu1 }
 0xe43   :  { %v2480_v54 = vadd.f32 %v884_v40, %v880_v51  ;;  %v909_v55 = vsel %vm189_vm2, %v2477_v50, 0.0 }
 0xe44   :  { %910 = vadd.xlane.f32.xlu0 %v909_v55 }
 0xe45   :  { %v912_v57 = vsel %vm193_vm3, %v2480_v54, 0.0 }
 0xe46   :  { %913 = vadd.xlane.f32.xlu1 %v912_v57 }
 0xed1   :  { %v911_v58 = vpop.xlane.xlu0 %910 }
 0xed2   :  { %v915_v59 = vmul.f32 0.03125, %v911_v58 }
 0xed3   :  { %v914_v22 = vpop.xlane.xlu1 %913 }
 0xed4   :  { %v917_v61 = vsub.f32 %v2477_v50, %v915_v59  ;;  %v916_v62 = vmul.f32 0.03125, %v914_v22 }
 0xed6   :  { %v918_v38 = vsub.f32 %v2480_v54, %v916_v62  ;;  %v919_v25 = vmul.f32 %v917_v61, %v917_v61 }
 0xed8   :  { %v921_v63 = vsel %vm189_vm2, %v919_v25, 0.0  ;;  %v920_v0 = vmul.f32 %v918_v38, %v918_v38 }
 0xed9   :  { %922 = vadd.xlane.f32.xlu0 %v921_v63 }
 0xeda   :  { %v924_v1 = vsel %vm193_vm3, %v920_v0, 0.0 }
 0xedb   :  { %925 = vadd.xlane.f32.xlu1 %v924_v1 }
 0xf66   :  { %v923_v4 = vpop.xlane.xlu0 %922 }
 0xf67   :  { %v927_v5 = vmul.f32 0.03125, %v923_v4 }
 0xf68   :  { %v926_v8 = vpop.xlane.xlu1 %925 }
 0xf69   :  { %v929_v7 = vadd.f32 1e-05, %v927_v5  ;;  %v928_v11 = vmul.f32 0.03125, %v926_v8 }
 0xf6b   :  { %2094 = vrsqrt.f32 %v929_v7  ;;  %v930_v12 = vadd.f32 1e-05, %v928_v11 }
 0xf6d   :  { %2096 = vrsqrt.f32 %v930_v12 }
 0xf75   :  { %v2095_v10 = vpop.eup %2094 }
 0xf76   :  { %v933_v15 = vmul.f32 %v2095_v10, %v917_v61 }
 0xf77   :  { %v2097_v16 = vpop.eup %2096 }
 0xf78   :  { %v939_v19 = vmul.f32 %v938_v13, %v933_v15  ;;  %v934_v20 = vmul.f32 %v2097_v16, %v918_v38 }
 0xf7a   :  { %v940_v23 = vmul.f32 %v938_v13, %v934_v20  ;;  %v945_v24 = vadd.f32 %v944_v18, %v939_v19 }
 0xf7c   :  { %v946_v26 = vadd.f32 %v944_v18, %v940_v23 }
 0xf7e   :  { %v947_v27 = vpack.c.bf16 %v946_v26, %v945_v24 }
 0xf80   :  { %1920 = vmatmul.mubr.msk.bf16.vlgmr.msra.gmra.mrb[4].mxu0 %vm189_vm2, %v947_v27 }
 0xf81   :  { %1925 = vmatprep.mubr.msk.bf16.mxu0 %vm2153_vm4, %v2152_v9 }
0x1053   :  { %v1001_v28 = vpop.f32.mrb[4].mxu0 }
0x1054   :  { %v1921_v29 = vpop.f32.mrb[5].mxu0  ;;  %v1002_v31 = vadd.f32 %v1001_v28, %v951_v17 }
0x1055   :  { %v1004_v56 = vpop.f32.mrb[6].mxu0 }
0x1056   :  { %v1005_v21 = vadd.f32 %v1004_v56, %v951_v17  ;;  %v1922_v32 = vpop.f32.mrb[7].mxu0 }
0x1058   :  { %v2516_v33 = vpack.c.bf16 %v1005_v21, %v1002_v31 }
0x105a   :  { %1010 = vrot.lane.b32.xlu0 %v2516_v33, %s2154_s18 }
0x105e   :  { %1137 = vrot.lane.b32.xlu0 %v2516_v33, %s2155_s19 }
0x1062   :  { %1135 = vrot.lane.b32.xlu0 %v2516_v33, %s2156_s20 }
0x10cc   :  { %v1011_v45 = vpop.permute.xlu0 %1010 }
0x10cd   :  { %v1016_v30 = vsel %vm353_vm5, %v1011_v45, 0 }
0x10ce   :  { %1924 = vmatpush3.bf16.xpose.msra.mxu0 %v1016_v30 }
0x10cf   :  { %1929 = vmatprep.subr.bf16.mxu0 %v2152_v9 }
0x10d0   :  { %v1138_v7 = vpop.permute.xlu0 %1137 }
0x10d1   :  { %v1143_v12 = vsel %vm353_vm5, %v1138_v7, 0 }
0x10d4   :  { %v1136_v13 = vpop.permute.xlu0 %1135 }
0x10d5   :  { %1926 = vmatmul.mubr.msk.bf16.vlgmr.msra.gmra.mrb[8].mxu0 %vm353_vm5, %v2516_v33 }
0x10d6   :  { %1931 = vmatprep.mubr.msk.bf16.mxu0 %vm2153_vm4, %v2152_v9 }
0x11a8   :  { %v1052_v14 = vpop.f32.mrb[8].mxu0 }
0x11a9   :  { %v1059_v60 = vmul.f32 0.25, %v1052_v14  ;;  %v1927_v34 = vpop.f32.mrb[9].mxu0 }
0x11aa   :  { %v1055_v35 = vpop.f32.mrb[10].mxu0 }
0x11ab   :  { %v1060_v36 = vmul.f32 0.25, %v1055_v35  ;;  %v1928_v37 = vpop.f32.mrb[11].mxu0  ;;  %v1061_v40 = vadd.f32 %v1059_v60, %v2340_v42 }
0x11ad   :  { %v1063_v41 = vsel %vm405_vm6, %v1061_v40, -inf  ;;  %v1062_v43 = vadd.f32 %v1060_v36, %v2345_v48 }
0x11ae   :  { %1064 = vmax.xlane.f32.xlu1 %v1063_v41 }
0x11af   :  { %v1066_v44 = vsel %vm409_vm7, %v1062_v43, -inf }
0x11b2   :  { %1067 = vmax.xlane.f32.xlu1 %v1066_v44 }
0x123b   :  { %v1065_v46 = vpop.xlane.xlu1 %1064 }
0x123c   :  { %v1069_v51 = vsub.f32 %v1061_v40, %v1065_v46 }
0x123e   :  { %v1071_v53 = vmul.f32 1.442695, %v1069_v51 }
0x123f   :  { %v1068_v55 = vpop.xlane.xlu1 %1067 }
0x1240   :  { %2098 = vpow2.f32 %v1071_v53  ;;  %v1070_v57 = vsub.f32 %v1062_v43, %v1068_v55 }
0x1242   :  { %v1073_v58 = vmul.f32 1.442695, %v1070_v57 }
0x1244   :  { %2100 = vpow2.f32 %v1073_v58 }
0x124a   :  { %v2099_v59 = vpop.eup %2098 }
0x124b   :  { %v1075_v22 = vsel %vm405_vm6, %v2099_v59, 0.0 }
0x124c   :  { %1076 = vadd.xlane.f32.xlu1 %v1075_v22 }
0x124e   :  { %v2101_v61 = vpop.eup %2100 }
0x124f   :  { %v1078_v62 = vsel %vm409_vm7, %v2101_v61, 0.0 }
0x1250   :  { %1079 = vadd.xlane.f32.xlu1 %v1078_v62 }
0x1261   :  { %1086 = vrot.lane.b32.xlu1 %v2516_v33, %s2157_s2 }
0x12d9   :  { %v1077_v38 = vpop.xlane.xlu1 %1076 }
0x12da   :  { %2102 = vrcp.f32 %v1077_v38 }
0x12dd   :  { %v1080_v25 = vpop.xlane.xlu1 %1079 }
0x12de   :  { %2104 = vrcp.f32 %v1080_v25 }
0x12e1   :  { %v1087_v63 = vpop.permute.xlu1 %1086 }
0x12e2   :  { %v1092_v0 = vsel %vm435_vm8, %v1087_v63, 0 }
0x12e3   :  { %1930 = vmatpush3.bf16.msra.mxu0 %v1092_v0 }
0x12e4   :  { %1935 = vmatprep.subr.bf16.mxu0 %v2152_v9  ;;  %v2103_v1 = vpop.eup %2102 }
0x12e5   :  { %v1082_v5 = vmul.f32 %v2103_v1, %v2099_v59 }
0x12e8   :  { %v2105_v4 = vpop.eup %2104 }
0x12e9   :  { %v1084_v8 = vmul.f32 %v2105_v4, %v2101_v61 }
0x12eb   :  { %v1085_v11 = vpack.c.bf16 %v1084_v8, %v1082_v5 }
0x12ed   :  { %1932 = vmatmul.mubr.msk.bf16.vlgmr.msra.gmra.mrb[12].mxu0 %vm405_vm6, %v1085_v11 }
0x12ee   :  { %1936 = vmatpush3.bf16.xpose.msra.mxu0 %v1143_v12  ;;  %1937 = vmatprep.mubr.msk.bf16.mxu0 %vm2153_vm4, %v2152_v9 }
0x12ef   :  { %1947 = vmatprep.subr.bf16.mxu0 %v2152_v9 }
0x12f5   :  { %1938 = vmatmul.mubr.msk.bf16.vlgmr.msra.gmra.mrb[16].mxu0 %vm353_vm5, %v1136_v13 }
0x12f6   :  { %1951 = vmatprep.mubr.msk.bf16.mxu0 %vm2153_vm4, %v2152_v9 }
0x13c0   :  { %v1128_v10 = vpop.f32.mrb[12].mxu0 }
0x13c1   :  { %v1933_v15 = vpop.f32.mrb[13].mxu0 }
0x13c2   :  { %v1131_v16 = vpop.f32.mrb[14].mxu0 }
0x13c3   :  { %v1934_v18 = vpop.f32.mrb[15].mxu0 }
0x13c8   :  { %v1179_v19 = vpop.f32.mrb[16].mxu0 }
0x13c9   :  { %v1186_v20 = vmul.f32 0.25, %v1179_v19  ;;  %v1939_v23 = vpop.f32.mrb[17].mxu0 }
0x13ca   :  { %v1182_v24 = vpop.f32.mrb[18].mxu0 }
0x13cb   :  { %v1187_v26 = vmul.f32 0.25, %v1182_v24  ;;  %v1940_v27 = vpop.f32.mrb[19].mxu0  ;;  %v1188_v17 = vadd.f32 %v1186_v20, %v2340_v42 }
0x13cc   :  { %v2050_v27 = vld [vmem:[%s2686_s5 + $0x24] ss:$8 sps:$4 sm:$0xff]  }
0x13cd   :  { %v1190_v28 = vsel %vm405_vm6, %v1188_v17, -inf  ;;  %v1189_v29 = vadd.f32 %v1187_v26, %v2345_v48 }
0x13ce   :  { %1191 = vmax.xlane.f32.xlu0 %v1190_v28 }
0x13cf   :  { %v1193_v56 = vsel %vm409_vm7, %v1189_v29, -inf }
0x13d0   :  { %1194 = vmax.xlane.f32.xlu1 %v1193_v56 }
0x13e1   :  { %1273 = vrot.lane.b32.xlu1 %v2493_v2, %s2159_s26 }
0x145b   :  { %v1192_v31 = vpop.xlane.xlu0 %1191 }
0x145c   :  { %v1196_v21 = vsub.f32 %v1188_v17, %v1192_v31  ;;  %v2051_v17 = vld [vmem:[%s2686_s5 + $0x34] ss:$8 sps:$4 sm:$0xff]  }
0x145d   :  { %v1195_v32 = vpop.xlane.xlu1 %1194 }
0x145e   :  { %v1198_v45 = vmul.f32 1.442695, %v1196_v21  ;;  %v1197_v30 = vsub.f32 %v1189_v29, %v1195_v32 }
0x1460   :  { %2106 = vpow2.f32 %v1198_v45  ;;  %v1200_v14 = vmul.f32 1.442695, %v1197_v30 }
0x1462   :  { %2108 = vpow2.f32 %v1200_v14 }
0x146a   :  { %v2107_v42 = vpop.eup %2106 }
0x146b   :  { %v1202_v60 = vsel %vm405_vm6, %v2107_v42, 0.0 }
0x146c   :  { %v2109_v34 = vpop.eup %2108  ;;  %1203 = vadd.xlane.f32.xlu0 %v1202_v60 }
0x146d   :  { %v1205_v48 = vsel %vm409_vm7, %v2109_v34, 0.0 }
0x1470   :  { %1206 = vadd.xlane.f32.xlu0 %v1205_v48 }
0x1486   :  { %1213 = vrot.lane.b32.xlu0 %v2516_v33, %s2158_s25  ;;  %v1274_v33 = vpop.permute.xlu1 %1273 }
0x1487   :  { %1948 = vmatpush3.bf16.msra.mxu0 %v1274_v33  ;;  %v2058_v33 = vld [vmem:[%s2687_s6 + $0x70] sm:$0xff]  }
0x1488   :  { %1949 = vmatprep.subr.bf16.mxu0 %v2152_v9 }
0x14f9   :  { %v1204_v2 = vpop.xlane.xlu0 %1203 }
0x14fa   :  { %2110 = vrcp.f32 %v1204_v2 }
0x14fd   :  { %v1207_v35 = vpop.xlane.xlu0 %1206 }
0x14fe   :  { %2112 = vrcp.f32 %v1207_v35 }
0x1501   :  { %v1214_v36 = vpop.permute.xlu0 %1213 }
0x1502   :  { %v1219_v37 = vsel %vm435_vm8, %v1214_v36, 0 }
0x1503   :  { %1942 = vmatpush3.bf16.msra.mxu1 %v1219_v37 }
0x1504   :  { %1955 = vmatprep.subr.bf16.mxu1 %v2152_v9  ;;  %v2111_v40 = vpop.eup %2110 }
0x1505   :  { %v1209_v43 = vmul.f32 %v2111_v40, %v2107_v42  ;;  %v2053_v40 = vld [vmem:[%s2687_s6 + $0x48] sm:$0xff]  }
0x1508   :  { %v2113_v41 = vpop.eup %2112 }
0x1509   :  { %v1211_v44 = vmul.f32 %v2113_v41, %v2109_v34  ;;  %v2054_v41 = vld [vmem:[%s2687_s6 + $0x50] sm:$0xff]  }
0x150b   :  { %v1212_v46 = vpack.c.bf16 %v1211_v44, %v1209_v43  ;;  %v2055_v43 = vld [vmem:[%s2687_s6 + $0x58] sm:$0xff]   ;;  %v2056_v44 = vld [vmem:[%s2687_s6 + $0x60] sm:$0xff]  }
0x150d   :  { %1944 = vmatmul.mubr.msk.bf16.vlgmr.msra.gmra.mrb[32].mxu1 %vm405_vm6, %v1212_v46  ;;  %v2057_v46 = vld [vmem:[%s2687_s6 + $0x68] sm:$0xff]  }
0x150e   :  { %1959 = vmatprep.mubr.msk.bf16.mxu1 %vm2153_vm4, %v2152_v9  ;;  %1956 = vmatpush3.bf16.msra.mxu1 %v2050_v27 }
0x150f   :  { %1957 = vmatprep.subr.bf16.mxu1 %v2152_v9 }
0x1512   :  { %1958 = vmatpush3.bf16.msra.mxu1 %v2051_v17 }
0x1513   :  { %1983 = vmatprep.subr.bf16.mxu1 %v2152_v9 }
0x15e0   :  { %v1255_v51 = vpop.f32.mrb[32].mxu1 }
0x15e1   :  { %v1945_v53 = vpop.f32.mrb[33].mxu1 }
0x15e2   :  { %v1258_v55 = vpop.f32.mrb[34].mxu1 }
0x15e3   :  { %v2015_v57 = vpack.i.bf16 %v1258_v55, %v1255_v51  ;;  %v1946_v58 = vpop.f32.mrb[35].mxu1  ;;  %v2059_v51 = vld [vmem:[%s2687_s6 + $0x78] sm:$0xff]  }
0x15e5   :  { %2016 = vrot.lane.b32.xlu1 %v2015_v57, %s2160_s27 }
0x15e9   :  { %1275 = vrot.lane.b32.xlu1 %v2499_v3, %s2159_s26  ;;  %v2576_v3 = vld [vmem:[%s2684_s3 + $0x10] sm:$0x1f] }
0x15ea   :  { %v1328_v0 = vrot.slane %v2576_v3, %v2262_v47  ;;  %v1360_v30 = vrot.slane %v2576_v3, %v2270_v49  ;;  %v1366_v48 = vrot.slane %v2576_v3, %v2425_v52  ;;  %v2052_v49 = vld [vmem:[%s2687_s6 + $0x40] sm:$0xff]   ;;  %v1373_v53 = vrot.slane %v2576_v3, %v2465_v6 }
0x1657   :  { %v2017_v59 = vpop.permute.xlu1 %2016 }
0x1658   :  { %v2019_v22 = vunpack.i.h.bf16 %v2017_v59  ;;  %v2018_v61 = vunpack.i.l.bf16 %v2017_v59 }
0x165a   :  { %v1271_v62 = vsel %vm353_vm5, %v1131_v16, %v2019_v22  ;;  %v1270_v38 = vsel %vm353_vm5, %v1128_v10, %v2018_v61 }
0x165b   :  { %v1272_v25 = vpack.c.bf16 %v1271_v62, %v1270_v38  ;;  %v1276_v63 = vpop.permute.xlu1 %1275 }
0x165c   :  { %1950 = vmatpush3.bf16.msra.mxu0 %v1276_v63 }
0x165d   :  { %1963 = vmatprep.subr.bf16.mxu0 %v2152_v9 }
0x165f   :  { %1952 = vmatmul.mubr.msk.bf16.vlgmr.msra.gmra.mrb[20].mxu0 %vm189_vm2, %v1272_v25 }
0x1660   :  { %1979 = vmatprep.mubr.msk.bf16.mxu0 %vm2153_vm4, %v2152_v9  ;;  %1964 = vmatpush3.bf16.msra.mxu0 %v2052_v49 }
0x1661   :  { %1965 = vmatprep.subr.bf16.mxu0 %v2152_v9 }
0x1664   :  { %1966 = vmatpush3.bf16.msra.mxu0 %v2053_v40 }
0x1665   :  { %1967 = vmatprep.subr.bf16.mxu0 %v2152_v9 }
0x1668   :  { %1968 = vmatpush3.bf16.msra.mxu0 %v2054_v41 }
0x1669   :  { %1969 = vmatprep.subr.bf16.mxu0 %v2152_v9 }
0x166c   :  { %1970 = vmatpush3.bf16.msra.mxu0 %v2055_v43 }
0x166d   :  { %1971 = vmatprep.subr.bf16.mxu0 %v2152_v9 }
0x1670   :  { %1972 = vmatpush3.bf16.msra.mxu0 %v2056_v44 }
0x1671   :  { %1973 = vmatprep.subr.bf16.mxu0 %v2152_v9 }
0x1674   :  { %1974 = vmatpush3.bf16.msra.mxu0 %v2057_v46 }
0x1675   :  { %1975 = vmatprep.subr.bf16.mxu0 %v2152_v9 }
0x1678   :  { %1976 = vmatpush3.bf16.msra.mxu0 %v2058_v33 }
0x1679   :  { %1977 = vmatprep.subr.bf16.mxu0 %v2152_v9 }
0x167c   :  { %1978 = vmatpush3.bf16.msra.mxu0 %v2059_v51 }
0x1732   :  { %v1316_v1 = vpop.f32.mrb[20].mxu0 }
0x1733   :  { %v1323_v4 = vadd.f32 %v1316_v1, %v2477_v50  ;;  %v1953_v5 = vpop.f32.mrb[21].mxu0 }
0x1734   :  { %v1319_v8 = vpop.f32.mrb[22].mxu0 }
0x1735   :  { %v2581_v7 = vadd.f32 %v1328_v0, %v1323_v4  ;;  %v1324_v11 = vadd.f32 %v1319_v8, %v2480_v54  ;;  %v1954_v12 = vpop.f32.mrb[23].mxu0 }
0x1737   :  { %v1331_v13 = vsel %vm189_vm2, %v2581_v7, 0.0  ;;  %v1330_v10 = vadd.f32 %v1328_v0, %v1324_v11 }
0x1738   :  { %1332 = vadd.xlane.f32.xlu0 %v1331_v13 }
0x1739   :  { %v1334_v15 = vsel %vm193_vm3, %v1330_v10, 0.0 }
0x173a   :  { %1335 = vadd.xlane.f32.xlu1 %v1334_v15 }
0x17c5   :  { %v1333_v16 = vpop.xlane.xlu0 %1332 }
0x17c6   :  { %v1337_v47 = vmul.f32 0.03125, %v1333_v16 }
0x17c7   :  { %v1336_v18 = vpop.xlane.xlu1 %1335 }
0x17c8   :  { %v1339_v50 = vsub.f32 %v2581_v7, %v1337_v47  ;;  %v1338_v19 = vmul.f32 0.03125, %v1336_v18 }
0x17ca   :  { %v1340_v20 = vsub.f32 %v1330_v10, %v1338_v19  ;;  %v1341_v23 = vmul.f32 %v1339_v50, %v1339_v50 }
0x17cc   :  { %v1343_v24 = vsel %vm189_vm2, %v1341_v23, 0.0  ;;  %v1342_v54 = vmul.f32 %v1340_v20, %v1340_v20 }
0x17cd   :  { %1344 = vadd.xlane.f32.xlu0 %v1343_v24 }
0x17ce   :  { %v1346_v26 = vsel %vm193_vm3, %v1342_v54, 0.0 }
0x17d1   :  { %1347 = vadd.xlane.f32.xlu0 %v1346_v26 }
0x185a   :  { %v1345_v28 = vpop.xlane.xlu0 %1344 }
0x185b   :  { %v1349_v29 = vmul.f32 0.03125, %v1345_v28 }
0x185d   :  { %v1351_v56 = vadd.f32 1e-05, %v1349_v29 }
0x185e   :  { %v1348_v31 = vpop.xlane.xlu0 %1347 }
0x185f   :  { %2114 = vrsqrt.f32 %v1351_v56  ;;  %v1350_v21 = vmul.f32 0.03125, %v1348_v31 }
0x1861   :  { %v1352_v32 = vadd.f32 1e-05, %v1350_v21 }
0x1863   :  { %2116 = vrsqrt.f32 %v1352_v32 }
0x1869   :  { %v2115_v45 = vpop.eup %2114 }
0x186a   :  { %v1355_v14 = vmul.f32 %v2115_v45, %v1339_v50 }
0x186c   :  { %v1361_v60 = vmul.f32 %v1360_v30, %v1355_v14 }
0x186d   :  { %v2117_v42 = vpop.eup %2116 }
0x186e   :  { %v1356_v34 = vmul.f32 %v2117_v42, %v1340_v20  ;;  %v1367_v35 = vadd.f32 %v1366_v48, %v1361_v60  ;;  %v1537_v20 = vrot.slane %v2576_v3, %v2472_v39 }
0x1870   :  { %v1362_v2 = vmul.f32 %v1360_v30, %v1356_v34 }
0x1872   :  { %v1368_v36 = vadd.f32 %v1366_v48, %v1362_v2 }
0x1874   :  { %v1369_v37 = vpack.c.bf16 %v1368_v36, %v1367_v35  ;;  %v2060_v36 = vld [vmem:[%s2688_s7] sm:$0xff]  }
0x1876   :  { %1960 = vmatmul.mubr.msk.bf16.vlgmr.msra.gmra.mrb[36].mxu1 %vm189_vm2, %v1369_v37 }
0x1877   :  { %1987 = vmatprep.mubr.msk.bf16.mxu1 %vm2153_vm4, %v2152_v9  ;;  %1984 = vmatpush3.bf16.msra.mxu1 %v2060_v36 }
0x1878   :  { %1985 = vmatprep.subr.bf16.mxu1 %v2152_v9 }
0x1949   :  { %v1419_v55 = vpop.f32.mrb[36].mxu1 }
0x194a   :  { %v1420_v57 = vadd.f32 %v1419_v55, %v1373_v53  ;;  %v1961_v58 = vpop.f32.mrb[37].mxu1 }
0x194b   :  { %v1422_v59 = vpop.f32.mrb[38].mxu1 }
0x194c   :  { %v1428_v22 = vmul.f32 0.044715, %v1420_v57  ;;  %v1423_v61 = vadd.f32 %v1422_v59, %v1373_v53  ;;  %v1962_v62 = vpop.f32.mrb[39].mxu1  ;;  %v1426_v15 = vmul.f32 0.5, %v1420_v57 }
0x194e   :  { %v1430_v38 = vmul.f32 %v1428_v22, %v1420_v57  ;;  %v1429_v25 = vmul.f32 0.044715, %v1423_v61  ;;  %v1427_v16 = vmul.f32 0.5, %v1423_v61 }
0x1950   :  { %v1432_v63 = vmul.f32 %v1430_v38, %v1420_v57  ;;  %v1431_v0 = vmul.f32 %v1429_v25, %v1423_v61 }
0x1952   :  { %v1434_v1 = vadd.f32 %v1432_v63, %v1420_v57  ;;  %v1433_v4 = vmul.f32 %v1431_v0, %v1423_v61 }
0x1954   :  { %v1436_v5 = vmul.f32 0.7978846, %v1434_v1  ;;  %v1435_v8 = vadd.f32 %v1433_v4, %v1423_v61 }
0x1956   :  { %2118 = vtanh.f32 %v1436_v5  ;;  %v1437_v11 = vmul.f32 0.7978846, %v1435_v8 }
0x1958   :  { %2120 = vtanh.f32 %v1437_v11 }
0x1960   :  { %v2119_v12 = vpop.eup %2118 }
0x1961   :  { %v1440_v13 = vadd.f32 1.0, %v2119_v12 }
0x1962   :  { %v2121_v10 = vpop.eup %2120 }
0x1963   :  { %v1441_v47 = vadd.f32 1.0, %v2121_v10  ;;  %v1442_v18 = vmul.f32 %v1440_v13, %v1426_v15 }
0x1965   :  { %v1443_v50 = vmul.f32 %v1441_v47, %v1427_v16 }
0x1967   :  { %v1444_v19 = vpack.c.bf16 %v1443_v50, %v1442_v18 }
0x1969   :  { %1980 = vmatmul.mubr.bf16.vlgmr.msra.gmra.mrb[24].mxu0 %v1444_v19 }
0x1a3c   :  { %v1527_v23 = vpop.f32.mrb[24].mxu0 }
0x1a3d   :  { %v1533_v24 = vadd.f32 %v1527_v23, %v2581_v7  ;;  %v1981_v54 = vpop.f32.mrb[25].mxu0  ;;  %v2126_v7 = vld [vmem:[%s2684_s3] sm:$0xff] }
0x1a3e   :  { %v1530_v26 = vpop.f32.mrb[26].mxu0  ;;  %v1555_v14 = vrot.slane %v2126_v7, %v2425_v52  ;;  %v1560_v34 = vrot.slane %v2126_v7, %v2465_v6  ;;  %v2061_v52 = vld [vmem:[%s2688_s7 + $0x8] sm:$0xff]   ;;  %v1642_v0 = vrot.slane %v2126_v7, %v2472_v39  ;;  %s2161_s7 = smov [#allocation2]  }
0x1a3f   :  { %v1982_v27 = vpop.f32.mrb[27].mxu0  ;;  %v1538_v17 = vadd.f32 %v1537_v20, %v1533_v24  ;;  %1986 = vmatpush3.bf16.msra.mxu1 %v2061_v52 }
0x1a40   :  { %1991 = vmatprep.subr.bf16.mxu1 %v2152_v9 }
0x1a41   :  { %v1539_v28 = vsel %vm193_vm3, %v1538_v17, 0.0 }
0x1a42   :  { %1540 = vadd.xlane.f32.xlu0 %v1539_v28 }
0x1acf   :  { %v1541_v29 = vpop.xlane.xlu0 %1540 }
0x1ad0   :  { %v1542_v56 = vmul.f32 0.03125, %v1541_v29 }
0x1ad2   :  { %v1543_v31 = vsub.f32 %v1538_v17, %v1542_v56 }
0x1ad4   :  { %v1544_v21 = vmul.f32 %v1543_v31, %v1543_v31 }
0x1ad6   :  { %v1545_v32 = vsel %vm193_vm3, %v1544_v21, 0.0 }
0x1ad7   :  { %1546 = vadd.xlane.f32.xlu1 %v1545_v32 }
0x1b64   :  { %v1547_v45 = vpop.xlane.xlu1 %1546 }
0x1b65   :  { %v1548_v30 = vmul.f32 0.03125, %v1547_v45 }
0x1b67   :  { %v1549_v3 = vadd.f32 1e-05, %v1548_v30 }
0x1b69   :  { %2122 = vrsqrt.f32 %v1549_v3 }
0x1b73   :  { %v2123_v42 = vpop.eup %2122 }
0x1b74   :  { %v1551_v60 = vmul.f32 %v2123_v42, %v1543_v31 }
0x1b76   :  { %v1556_v48 = vmul.f32 %v1555_v14, %v1551_v60 }
0x1b78   :  { %v1561_v2 = vadd.f32 %v1560_v34, %v1556_v48 }
0x1b7a   :  { %v1563_v35 = vsel %vm1562_vm9, %v1561_v2, 0.0  ;;  %v1638_v59 = vpack.c.bf16 %v1561_v2, %v1561_v2 }
0x1b7b   :  { %1564 = vadd.xlane.f32.xlu0 %v1563_v35 }
0x1b7c   :  { %v1644_v61 = vrot.slane %v1638_v59, 1 }
0x1b91   :  { %1645 = vrot.lane.b32.xlu0 %v2060_v36, %s2156_s20 }
0x1c08   :  { %v1565_v6 = vpop.xlane.xlu0 %1564 }
0x1c09   :  { %v1566_v37 = vmul.f32 0.03125, %v1565_v6 }
0x1c0b   :  { %v1567_v49 = vsub.f32 %v1561_v2, %v1566_v37 }
0x1c0c   :  { %v1646_v58 = vpop.permute.xlu0 %1645 }
0x1c0d   :  { %v1568_v40 = vmul.f32 %v1567_v49, %v1567_v49 }
0x1c0f   :  { %v1569_v41 = vsel %vm1562_vm9, %v1568_v40, 0.0 }
0x1c10   :  { %1570 = vadd.xlane.f32.xlu1 %v1569_v41 }
0x1c21   :  { %1647 = vrot.lane.b32.xlu1 %v2061_v52, %s2156_s20  ;;  %s1706_s20 = sshll.u32 %s2161_s7, 4  ;;  %s1707_s20 = int_to_ptr.vmem [resolvable:$true] %s1706_s20 }
0x1c22   :  { %s2127_s19 = scalar_lea.vmem %s1707_s20, 32  ;;  %p2132_p1 = scmp.lt.s32.totalorder %s1707_s20, %s1707_s20 }
0x1c23   :  { %p2128_p0 = scmp.ne.s32.totalorder %s1707_s20, %s2127_s19  ;;  %p2133_p2 = scmp.lt.s32.totalorder %s2127_s19, %s2127_s19 }
0x1c25   :  { %p2134_p3 = por %p2133_p2, %p2132_p1 }
0x1c27   :  { %p2135_p4 = pnand %p2134_p3, %p2128_p0 }
0x1c9d   :  { %v1571_v43 = vpop.xlane.xlu1 %1570 }
0x1c9e   :  { %v1572_v44 = vmul.f32 0.03125, %v1571_v43 }
0x1ca0   :  { %v1573_v46 = vadd.f32 1e-05, %v1572_v44 }
0x1ca1   :  { %v1648_v22 = vpop.permute.xlu1 %1647 }
0x1ca2   :  { %2124 = vrsqrt.f32 %v1573_v46 }
0x1cac   :  { %v2125_v33 = vpop.eup %2124 }
0x1cad   :  { %v1575_v51 = vmul.f32 %v2125_v33, %v1567_v49 }
0x1caf   :  { %v1576_v53 = vmul.f32 %v1575_v51, %v1555_v14 }
0x1cb1   :  { %v1577_v55 = vadd.f32 %v1576_v53, %v1560_v34 }
0x1cb3   :  { %v1578_v57 = vpack.c.bf16 %v1577_v55, %v1577_v55 }
0x1cb5   :  { %1988 = vmatmul.mubr.msk.bf16.vlgmr.msra.gmra.mrb[40].mxu1 %vm189_vm2, %v1578_v57 }
0x1cb6   :  { %1992 = vmatpush3.bf16.msra.mxu1 %v1646_v58  ;;  %1995 = vmatprep.mubr.msk.bf16.mxu1 %vm2153_vm4, %v2152_v9 }
0x1cb7   :  { %1993 = vmatprep.subr.bf16.mxu1 %v2152_v9 }
0x1cba   :  { %1994 = vmatpush3.bf16.msra.mxu1 %v1648_v22 }
0x1cbd   :  { %1996 = vmatmul.mubr.msk.bf16.vlgmr.msra.gmra.mrb[44].mxu1 %vm189_vm2, %v1644_v61 }
0x1d88   :  { %v1632_v62 = vpop.f32.mrb[40].mxu1 }
0x1d89   :  { %v1989_v38 = vpop.f32.mrb[41].mxu1 }
0x1d8a   :  { %v1635_v25 = vpop.f32.mrb[42].mxu1 }
0x1d8b   :  { %v1990_v63 = vpop.f32.mrb[43].mxu1 }
0x1d90   :  { %v1688_v1 = vpop.f32.mrb[44].mxu1 }
0x1d91   :  { %v1689_v4 = vadd.f32 %v1688_v1, %v1642_v0  ;;  %v1997_v5 = vpop.f32.mrb[45].mxu1 }
0x1d92   :  { %v1691_v8 = vpop.f32.mrb[46].mxu1 }
0x1d93   :  { %1695 = vrot.lane.b32.xlu1 %v1689_v4, %s2160_s27  ;;  %v1998_v11 = vpop.f32.mrb[47].mxu1 }
0x1e05   :  { %v1696_v9 = vpop.permute.xlu1 %1695 }
0x1e06   :  { %v1698_v12 = vsel %vm353_vm5, %v1632_v62, %v1696_v9 }
0x1e07   :  { %1699 = vst.msk [vmem:[#allocation2] sm:$0x3] %vm1562_vm9, %v1698_v12 }
0x1e08   :  { %2138 = shalt.err (!%p2135_p4)
}
0x1e09   :  { %s2139_s27 = scalar_lea.hbm %s2689_s8, 32 }
0x1e0a   :  { %p2140_p5 = scmp.ne.s32.totalorder %s2689_s8, %s2139_s27  ;;  %p2143_p6 = scmp.lt.u32.totalorder %s2139_s27, %s2689_s8 }
0x1e0c   :  { %p2145_p7 = pnand %p2143_p6, %p2140_p5 }
0x1e0e   :  { %2148 = shalt.err (!%p2145_p7)
}
0x1e0f   :  { %1709 = dma.vmem_to_hbm [thread:$0]  %s1707_s20, 32, %s2689_s8, [#allocation3]  }
0x1e10   :  { %2149 = dma.done.wait [#allocation3], 32  }
0x1e11   :  { %2150 = vsyncadd [#allocation3], 4294967264 }
0x1e12   :  { %1713 = vsyncpa [#allocation3], 1 }

</bundles_post_ra>
